<compile_context>
chip_gen: v7x
topology: tpu7x:2x2x1
jax: 0.10.0
libtpu: 0.0.40
codegen_flags: <defaults>
</compile_context>

<pallas_src>
import jax
import jax.numpy as jnp
from jax.experimental import pallas as pl
from jax.experimental.pallas import tpu as pltpu

IN_DIM = 28 * 28   # 784
HID = 512
OUT_DIM = 10
OUT_PAD = 128      # lane-dense padded output width


def mlp_kernel(x_ref, w1_ref, b1_ref, w2_ref, b2_ref, w3_ref, b3_ref, o_ref):
    # In-kernel cast of the input tile (f32 -> bf16) on the VPU.
    x = x_ref[...].astype(jnp.bfloat16)
    # Layer 1: bf16 [TM,784] @ bf16 [784,512] -> f32 acc, +bias, ReLU
    h1 = jnp.dot(x, w1_ref[...], preferred_element_type=jnp.float32)
    h1 = jnp.maximum(h1 + b1_ref[...], 0.0).astype(jnp.bfloat16)
    # Layer 2: bf16 [TM,512] @ bf16 [512,512] -> f32 acc, +bias, ReLU
    h2 = jnp.dot(h1, w2_ref[...], preferred_element_type=jnp.float32)
    h2 = jnp.maximum(h2 + b2_ref[...], 0.0).astype(jnp.bfloat16)
    # Layer 3: bf16 [TM,512] @ bf16 [512,128] (lane-padded) -> f32 acc, +bias, ReLU
    h3 = jnp.dot(h2, w3_ref[...], preferred_element_type=jnp.float32)
    o_ref[...] = jnp.maximum(h3 + b3_ref[...], 0.0).astype(o_ref.dtype)


def prepare_params(w1, b1, w2, b2, w3, b3):
    """One-time conversion: bf16 weights, f32 biases, lane-padded last layer.

    Do this once (e.g. at init/load time) and reuse the result for every
    forward call, so no per-call dtype-cast / pad passes hit HBM.
    """
    return dict(
        w1=w1.astype(jnp.bfloat16),
        b1=b1.reshape(1, HID).astype(jnp.float32),
        w2=w2.astype(jnp.bfloat16),
        b2=b2.reshape(1, HID).astype(jnp.float32),
        w3=jnp.pad(w3, ((0, 0), (0, OUT_PAD - OUT_DIM))).astype(jnp.bfloat16),
        b3=jnp.pad(b3.reshape(1, OUT_DIM),
                   ((0, 0), (0, OUT_PAD - OUT_DIM))).astype(jnp.float32),
    )


def _pick_tm(B):
    """Batch tile: up to 512 rows, multiple of 8, >= 2 tiles when possible."""
    b8 = max(8, ((B + 7) // 8) * 8)
    tm = min(512, b8)
    # Keep at least 2 grid tiles so v7x can shard the parallel batch axis
    # across both TensorCores.
    if b8 >= 16 and pl.cdiv(b8, tm) < 2:
        tm = ((b8 // 2 + 7) // 8) * 8
    return tm


def mlp_forward(x_nchw, params, *, tm=None):
    """x_nchw: [B, 1, 28, 28] float32 -> logits [B, 10] float32."""
    B = x_nchw.shape[0]
    x_flat = x_nchw.reshape(B, -1)  # nn.Flatten: [B, 784], stays f32

    if tm is None:
        tm = _pick_tm(B)
    n_tiles = pl.cdiv(B, tm)
    Bp = n_tiles * tm
    if Bp != B:
        x_flat = jnp.pad(x_flat, ((0, Bp - B), (0, 0)))

    # Resident (constant index_map) operands are single-buffered.
    resident = dict(pipeline_mode=pl.Buffered(1))

    out = pl.pallas_call(
        mlp_kernel,
        out_shape=jax.ShapeDtypeStruct((Bp, OUT_PAD), jnp.float32),
        grid=(n_tiles,),
        in_specs=[
            pl.BlockSpec((tm, IN_DIM), lambda i: (i, 0)),                   # x (f32): tiled over batch
            pl.BlockSpec((IN_DIM, HID), lambda i: (0, 0), **resident),      # w1: resident
            pl.BlockSpec((1, HID), lambda i: (0, 0), **resident),           # b1: resident
            pl.BlockSpec((HID, HID), lambda i: (0, 0), **resident),         # w2: resident
            pl.BlockSpec((1, HID), lambda i: (0, 0), **resident),           # b2: resident
            pl.BlockSpec((HID, OUT_PAD), lambda i: (0, 0), **resident),     # w3 (padded): resident
            pl.BlockSpec((1, OUT_PAD), lambda i: (0, 0), **resident),       # b3 (padded): resident
        ],
        out_specs=pl.BlockSpec((tm, OUT_PAD), lambda i: (i, 0)),
        compiler_params=pltpu.CompilerParams(
            dimension_semantics=("parallel",),
            vmem_limit_bytes=32 << 20,
        ),
    )(x_flat, params["w1"], params["b1"], params["w2"], params["b2"],
      params["w3"], params["b3"])

    return out[:B, :OUT_DIM]


def init_params(key):
    """Deterministic init mirroring nn.Linear's uniform(-1/sqrt(fan_in), 1/sqrt(fan_in))."""
    ks = jax.random.split(key, 6)

    def lin(kw, kb, fan_in, fan_out):
        bound = 1.0 / jnp.sqrt(float(fan_in))
        w = jax.random.uniform(kw, (fan_in, fan_out), jnp.float32, -bound, bound)
        b = jax.random.uniform(kb, (1, fan_out), jnp.float32, -bound, bound)
        return w, b

    w1, b1 = lin(ks[0], ks[1], IN_DIM, HID)
    w2, b2 = lin(ks[2], ks[3], HID, HID)
    w3, b3 = lin(ks[4], ks[5], HID, OUT_DIM)
    return w1, b1, w2, b2, w3, b3


if __name__ == "__main__":
    key = jax.random.PRNGKey(0)
    k_x, k_p = jax.random.split(key)

    B = 8
    x = jax.random.normal(k_x, (B, 1, 28, 28), dtype=jnp.float32)
    w1, b1, w2, b2, w3, b3 = init_params(k_p)

    # One-time parameter preparation (hoisted out of the forward path).
    params = jax.tree_util.tree_map(jax.block_until_ready,
                                    prepare_params(w1, b1, w2, b2, w3, b3))

    fwd = jax.jit(lambda xin: mlp_forward(xin, params))
    logits = jax.block_until_ready(fwd(x))

    # Pure-JAX reference with the same bf16 rounding of inputs/weights
    # (accumulation in f32), so the only difference is summation order.
    def bf(a):
        return a.astype(jnp.bfloat16).astype(jnp.float32)

    xf = bf(x.reshape(B, -1))
    ref = jnp.maximum(xf @ bf(w1) + b1, 0.0)
    ref = jnp.maximum(bf(ref) @ bf(w2) + b2, 0.0)
    ref = jnp.maximum(bf(ref) @ bf(w3) + b3, 0.0)

    assert logits.shape == (B, OUT_DIM)
    assert jnp.allclose(logits, ref, atol=1e-3, rtol=1e-3), (
        float(jnp.max(jnp.abs(logits - ref)))
    )

    print("KERNEL_OK")
</pallas_src>

<mosaic_0001>
module attributes {stable_mosaic.version = 11 : i64} {
  func.func @mlp_kernel(%arg0: i32, %arg1: memref<8x784xf32, #tpu.memory_space<vmem>>, %arg2: memref<784x512xbf16, #tpu.memory_space<vmem>>, %arg3: memref<1x512xf32, #tpu.memory_space<vmem>>, %arg4: memref<512x512xbf16, #tpu.memory_space<vmem>>, %arg5: memref<1x512xf32, #tpu.memory_space<vmem>>, %arg6: memref<512x128xbf16, #tpu.memory_space<vmem>>, %arg7: memref<1x128xf32, #tpu.memory_space<vmem>>, %arg8: memref<8x128xf32, #tpu.memory_space<vmem>>) attributes {dimension_semantics = [#tpu.dimension_semantics<parallel>], iteration_bounds = array<i64: 1>, scalar_prefetch = 0 : i64, scratch_operands = 0 : i64, tpu.core_type = #tpu.core_type<tc>, window_params = [{transform_indices = @transform_0, window_bounds = array<i64: 8, 784>}, {pipeline_mode = #tpu.pipeline_mode<synchronous>, transform_indices = @transform_1, window_bounds = array<i64: 784, 512>}, {pipeline_mode = #tpu.pipeline_mode<synchronous>, transform_indices = @transform_2, window_bounds = array<i64: 1, 512>}, {pipeline_mode = #tpu.pipeline_mode<synchronous>, transform_indices = @transform_3, window_bounds = array<i64: 512, 512>}, {pipeline_mode = #tpu.pipeline_mode<synchronous>, transform_indices = @transform_4, window_bounds = array<i64: 1, 512>}, {pipeline_mode = #tpu.pipeline_mode<synchronous>, transform_indices = @transform_5, window_bounds = array<i64: 512, 128>}, {pipeline_mode = #tpu.pipeline_mode<synchronous>, transform_indices = @transform_6, window_bounds = array<i64: 1, 128>}, {transform_indices = @transform_7, window_bounds = array<i64: 8, 128>}]} {
    %c0 = arith.constant 0 : index
    %c0_0 = arith.constant 0 : index
    %0 = vector.load %arg1[%c0, %c0_0] : memref<8x784xf32, #tpu.memory_space<vmem>>, vector<8x784xf32>
    %1 = arith.truncf %0 : vector<8x784xf32> to vector<8x784xbf16>
    %c0_1 = arith.constant 0 : index
    %c0_2 = arith.constant 0 : index
    %2 = vector.load %arg2[%c0_1, %c0_2] : memref<784x512xbf16, #tpu.memory_space<vmem>>, vector<784x512xbf16>
    %cst = arith.constant dense<0.000000e+00> : vector<8x512xf32>
    %3 = tpu.matmul %1, %2, %cst {dimension_numbers = #tpu.dot_dimension_numbers<[1], [0], [0], [1], [0, 0, 1, 1], [], []>} : vector<8x784xbf16>, vector<784x512xbf16>, vector<8x512xf32> -> vector<8x512xf32>
    %c0_3 = arith.constant 0 : index
    %c0_4 = arith.constant 0 : index
    %4 = vector.load %arg3[%c0_3, %c0_4] : memref<1x512xf32, #tpu.memory_space<vmem>>, vector<1x512xf32>
    %5 = vector.broadcast %4 : vector<1x512xf32> to vector<8x512xf32>
    %6 = arith.addf %3, %5 : vector<8x512xf32>
    %cst_5 = arith.constant 0.000000e+00 : f32
    %7 = vector.broadcast %cst_5 : f32 to vector<8x512xf32>
    %8 = arith.maximumf %6, %7 : vector<8x512xf32>
    %9 = arith.truncf %8 : vector<8x512xf32> to vector<8x512xbf16>
    %c0_6 = arith.constant 0 : index
    %c0_7 = arith.constant 0 : index
    %10 = vector.load %arg4[%c0_6, %c0_7] : memref<512x512xbf16, #tpu.memory_space<vmem>>, vector<512x512xbf16>
    %cst_8 = arith.constant dense<0.000000e+00> : vector<8x512xf32>
    %11 = tpu.matmul %9, %10, %cst_8 {dimension_numbers = #tpu.dot_dimension_numbers<[1], [0], [0], [1], [0, 0, 1, 1], [], []>} : vector<8x512xbf16>, vector<512x512xbf16>, vector<8x512xf32> -> vector<8x512xf32>
    %c0_9 = arith.constant 0 : index
    %c0_10 = arith.constant 0 : index
    %12 = vector.load %arg5[%c0_9, %c0_10] : memref<1x512xf32, #tpu.memory_space<vmem>>, vector<1x512xf32>
    %13 = vector.broadcast %12 : vector<1x512xf32> to vector<8x512xf32>
    %14 = arith.addf %11, %13 : vector<8x512xf32>
    %cst_11 = arith.constant 0.000000e+00 : f32
    %15 = vector.broadcast %cst_11 : f32 to vector<8x512xf32>
    %16 = arith.maximumf %14, %15 : vector<8x512xf32>
    %17 = arith.truncf %16 : vector<8x512xf32> to vector<8x512xbf16>
    %c0_12 = arith.constant 0 : index
    %c0_13 = arith.constant 0 : index
    %18 = vector.load %arg6[%c0_12, %c0_13] : memref<512x128xbf16, #tpu.memory_space<vmem>>, vector<512x128xbf16>
    %cst_14 = arith.constant dense<0.000000e+00> : vector<8x128xf32>
    %19 = tpu.matmul %17, %18, %cst_14 {dimension_numbers = #tpu.dot_dimension_numbers<[1], [0], [0], [1], [0, 0, 1, 1], [], []>} : vector<8x512xbf16>, vector<512x128xbf16>, vector<8x128xf32> -> vector<8x128xf32>
    %c0_15 = arith.constant 0 : index
    %c0_16 = arith.constant 0 : index
    %20 = vector.load %arg7[%c0_15, %c0_16] : memref<1x128xf32, #tpu.memory_space<vmem>>, vector<1x128xf32>
    %21 = vector.broadcast %20 : vector<1x128xf32> to vector<8x128xf32>
    %22 = arith.addf %19, %21 : vector<8x128xf32>
    %cst_17 = arith.constant 0.000000e+00 : f32
    %23 = vector.broadcast %cst_17 : f32 to vector<8x128xf32>
    %24 = arith.maximumf %22, %23 : vector<8x128xf32>
    %c0_18 = arith.constant 0 : index
    %c0_19 = arith.constant 0 : index
    %25 = vector.load %arg8[%c0_18, %c0_19] : memref<8x128xf32, #tpu.memory_space<vmem>>, vector<8x128xf32>
    tpu.vector_store %arg8[%c0_18, %c0_19], %24 {strides = array<i32>} : memref<8x128xf32, #tpu.memory_space<vmem>>, vector<8x128xf32>,
    return
  }
  func.func @transform_0(%arg0: i32) -> (i32, i32) {
    %c0_i32 = arith.constant 0 : i32
    %c0_i32_0 = arith.constant 0 : i32
    return %arg0, %c0_i32 : i32, i32
  }
  func.func @transform_1(%arg0: i32) -> (i32, i32) {
    %c0_i32 = arith.constant 0 : i32
    %c0_i32_0 = arith.constant 0 : i32
    %c0_i32_1 = arith.constant 0 : i32
    return %c0_i32, %c0_i32_0 : i32, i32
  }
  func.func @transform_2(%arg0: i32) -> (i32, i32) {
    %c0_i32 = arith.constant 0 : i32
    %c0_i32_0 = arith.constant 0 : i32
    %c0_i32_1 = arith.constant 0 : i32
    return %c0_i32, %c0_i32_0 : i32, i32
  }
  func.func @transform_3(%arg0: i32) -> (i32, i32) {
    %c0_i32 = arith.constant 0 : i32
    %c0_i32_0 = arith.constant 0 : i32
    %c0_i32_1 = arith.constant 0 : i32
    return %c0_i32, %c0_i32_0 : i32, i32
  }
  func.func @transform_4(%arg0: i32) -> (i32, i32) {
    %c0_i32 = arith.constant 0 : i32
    %c0_i32_0 = arith.constant 0 : i32
    %c0_i32_1 = arith.constant 0 : i32
    return %c0_i32, %c0_i32_0 : i32, i32
  }
  func.func @transform_5(%arg0: i32) -> (i32, i32) {
    %c0_i32 = arith.constant 0 : i32
    %c0_i32_0 = arith.constant 0 : i32
    %c0_i32_1 = arith.constant 0 : i32
    return %c0_i32, %c0_i32_0 : i32, i32
  }
  func.func @transform_6(%arg0: i32) -> (i32, i32) {
    %c0_i32 = arith.constant 0 : i32
    %c0_i32_0 = arith.constant 0 : i32
    %c0_i32_1 = arith.constant 0 : i32
    return %c0_i32, %c0_i32_0 : i32, i32
  }
  func.func @transform_7(%arg0: i32) -> (i32, i32) {
    %c0_i32 = arith.constant 0 : i32
    %c0_i32_0 = arith.constant 0 : i32
    return %arg0, %c0_i32 : i32, i32
  }
}

</mosaic_0001>

<bundles_post_ra>
// kernel: _lambda_.1
= control target key start
LH: loop header
LB: loop body
LE: loop exit
PB: predicated region body
PF: predicated region fallthrough
CT: control target
= control target key end

     0   :  { %vm1240_vm0 = vcmask 130048   ;;  %s5071_s0 = inlined_call_operand.vmem [shape: f32[8,784], index: 0, kind: input, shape index: {}]   ;;  %s5072_s1 = inlined_call_operand.vmem [shape: bf16[784,512], index: 1, kind: input, shape index: {}]   ;;  %s5073_s2 = inlined_call_operand.vmem [shape: f32[1,512], index: 2, kind: input, shape index: {}]   ;;  %s5074_s3 = inlined_call_operand.vmem [shape: bf16[512,512], index: 3, kind: input, shape index: {}]   ;;  %s5075_s4 = inlined_call_operand.vmem [shape: f32[1,512], index: 4, kind: input, shape index: {}]   ;;  %s5076_s5 = inlined_call_operand.vmem [shape: bf16[512,128], index: 5, kind: input, shape index: {}]   ;;  %s5077_s6 = inlined_call_operand.vmem [shape: f32[1,128], index: 6, kind: input, shape index: {}]   ;;  %s5078_s7 = inlined_call_operand.hbm [shape: f32[8,128], index: 7, kind: output, shape index: {}]  }
   0x1   :  { %v3346_v0 = vld [vmem:[%s5072_s1 + $0x4] ss:$16 sps:$4 sm:$0xff]   ;;  %v3348_v1 = vld [vmem:[%s5072_s1 + $0xc] ss:$16 sps:$4 sm:$0xff]   ;;  %v3350_v2 = vld [vmem:[%s5072_s1] ss:$16 sps:$4 sm:$0xff]  }
   0x2   :  { %1244 = vmatprep.subr.bf16.mxu0 %v3346_v0  ;;  %v3351_v3 = vld [vmem:[%s5072_s1 + $0x8] ss:$16 sps:$4 sm:$0xff]   ;;  %1408 = vmatprep.subr.bf16.mxu1 %v3348_v1  ;;  %v3352_v4 = vld [vmem:[%s5072_s1 + $0x24] ss:$16 sps:$4 sm:$0xff]   ;;  %v3354_v5 = vld [vmem:[%s5072_s1 + $0x2c] ss:$16 sps:$4 sm:$0xff]  }
   0x3   :  { %1245 = vmatpush1.bf16.msra.mxu0 %v3350_v2  ;;  %1409 = vmatpush1.bf16.msra.mxu1 %v3351_v3  ;;  %v3356_v6 = vld [vmem:[%s5072_s1 + $0x20] ss:$16 sps:$4 sm:$0xff]   ;;  %v3357_v7 = vld [vmem:[%s5072_s1 + $0x28] ss:$16 sps:$4 sm:$0xff]   ;;  %v3358_v8 = vld [vmem:[%s5072_s1 + $0x44] ss:$16 sps:$4 sm:$0xff]  }
   0x4   :  { %1246 = vmatprep.subr.bf16.mxu0 %v3352_v4  ;;  %1410 = vmatprep.subr.bf16.mxu1 %v3354_v5  ;;  %v3360_v9 = vld [vmem:[%s5072_s1 + $0x4c] ss:$16 sps:$4 sm:$0xff]   ;;  %v3362_v10 = vld [vmem:[%s5072_s1 + $0x40] ss:$16 sps:$4 sm:$0xff]   ;;  %v3363_v11 = vld [vmem:[%s5072_s1 + $0x48] ss:$16 sps:$4 sm:$0xff]  }
   0x5   :  { %v3364_v12 = vld [vmem:[%s5072_s1 + $0x64] ss:$16 sps:$4 sm:$0xff]   ;;  %v3366_v13 = vld [vmem:[%s5072_s1 + $0x6c] ss:$16 sps:$4 sm:$0xff]   ;;  %v3368_v14 = vld [vmem:[%s5072_s1 + $0x60] ss:$16 sps:$4 sm:$0xff]  }
   0x6   :  { %v3369_v15 = vld [vmem:[%s5072_s1 + $0x68] ss:$16 sps:$4 sm:$0xff]   ;;  %v3370_v16 = vld [vmem:[%s5072_s1 + $0x84] ss:$16 sps:$4 sm:$0xff]   ;;  %v3372_v17 = vld [vmem:[%s5072_s1 + $0x8c] ss:$16 sps:$4 sm:$0xff]  }
   0x7   :  { %1247 = vmatpush1.bf16.msra.mxu0 %v3356_v6  ;;  %1411 = vmatpush1.bf16.msra.mxu1 %v3357_v7  ;;  %v3374_v18 = vld [vmem:[%s5072_s1 + $0x80] ss:$16 sps:$4 sm:$0xff]   ;;  %v3375_v19 = vld [vmem:[%s5072_s1 + $0x88] ss:$16 sps:$4 sm:$0xff]   ;;  %v3376_v20 = vld [vmem:[%s5072_s1 + $0xa4] ss:$16 sps:$4 sm:$0xff]  }
   0x8   :  { %1248 = vmatprep.subr.bf16.mxu0 %v3358_v8  ;;  %1412 = vmatprep.subr.bf16.mxu1 %v3360_v9  ;;  %v3378_v21 = vld [vmem:[%s5072_s1 + $0xac] ss:$16 sps:$4 sm:$0xff]   ;;  %v3380_v22 = vld [vmem:[%s5072_s1 + $0xa0] ss:$16 sps:$4 sm:$0xff]   ;;  %v3381_v23 = vld [vmem:[%s5072_s1 + $0xa8] ss:$16 sps:$4 sm:$0xff]  }
   0x9   :  { %v3382_v24 = vld [vmem:[%s5072_s1 + $0xc4] ss:$16 sps:$4 sm:$0xff]   ;;  %v3384_v25 = vld [vmem:[%s5072_s1 + $0xcc] ss:$16 sps:$4 sm:$0xff]   ;;  %v3386_v26 = vld [vmem:[%s5072_s1 + $0xc0] ss:$16 sps:$4 sm:$0xff]  }
   0xa   :  { %v3387_v27 = vld [vmem:[%s5072_s1 + $0xc8] ss:$16 sps:$4 sm:$0xff]   ;;  %v3388_v28 = vld [vmem:[%s5072_s1 + $0xe4] ss:$16 sps:$4 sm:$0xff]   ;;  %v3390_v29 = vld [vmem:[%s5072_s1 + $0xec] ss:$16 sps:$4 sm:$0xff]  }
   0xb   :  { %1249 = vmatpush1.bf16.msra.mxu0 %v3362_v10  ;;  %1413 = vmatpush1.bf16.msra.mxu1 %v3363_v11  ;;  %v3392_v30 = vld [vmem:[%s5072_s1 + $0xe0] ss:$16 sps:$4 sm:$0xff]   ;;  %v3393_v31 = vld [vmem:[%s5072_s1 + $0xe8] ss:$16 sps:$4 sm:$0xff]   ;;  %v3394_v32 = vld [vmem:[%s5072_s1 + $0x104] ss:$16 sps:$4 sm:$0xff]  }
   0xc   :  { %1250 = vmatprep.subr.bf16.mxu0 %v3364_v12  ;;  %1414 = vmatprep.subr.bf16.mxu1 %v3366_v13  ;;  %v3396_v33 = vld [vmem:[%s5072_s1 + $0x10c] ss:$16 sps:$4 sm:$0xff]   ;;  %v3398_v34 = vld [vmem:[%s5072_s1 + $0x100] ss:$16 sps:$4 sm:$0xff]   ;;  %v3399_v35 = vld [vmem:[%s5072_s1 + $0x108] ss:$16 sps:$4 sm:$0xff]  }
   0xd   :  { %v3400_v36 = vld [vmem:[%s5072_s1 + $0x124] ss:$16 sps:$4 sm:$0xff]   ;;  %v3402_v37 = vld [vmem:[%s5072_s1 + $0x12c] ss:$16 sps:$4 sm:$0xff]   ;;  %v3404_v38 = vld [vmem:[%s5072_s1 + $0x120] ss:$16 sps:$4 sm:$0xff]  }
   0xe   :  { %v3405_v39 = vld [vmem:[%s5072_s1 + $0x128] ss:$16 sps:$4 sm:$0xff]   ;;  %v3406_v40 = vld [vmem:[%s5072_s1 + $0x144] ss:$16 sps:$4 sm:$0xff]   ;;  %v3408_v41 = vld [vmem:[%s5072_s1 + $0x14c] ss:$16 sps:$4 sm:$0xff]  }
   0xf   :  { %1251 = vmatpush1.bf16.msra.mxu0 %v3368_v14  ;;  %1415 = vmatpush1.bf16.msra.mxu1 %v3369_v15  ;;  %v3410_v42 = vld [vmem:[%s5072_s1 + $0x140] ss:$16 sps:$4 sm:$0xff]   ;;  %v3411_v43 = vld [vmem:[%s5072_s1 + $0x148] ss:$16 sps:$4 sm:$0xff]   ;;  %v3412_v44 = vld [vmem:[%s5072_s1 + $0x164] ss:$16 sps:$4 sm:$0xff]  }
  0x10   :  { %1252 = vmatprep.subr.bf16.mxu0 %v3370_v16  ;;  %1416 = vmatprep.subr.bf16.mxu1 %v3372_v17  ;;  %v3414_v45 = vld [vmem:[%s5072_s1 + $0x16c] ss:$16 sps:$4 sm:$0xff]   ;;  %v3416_v47 = vld [vmem:[%s5072_s1 + $0x160] ss:$16 sps:$4 sm:$0xff]   ;;  %v3417_v49 = vld [vmem:[%s5072_s1 + $0x168] ss:$16 sps:$4 sm:$0xff]  }
  0x11   :  { %v29_v46 = vld [vmem:[%s5071_s0 + $0x8] sm:$0xff]  ;;  %v3418_v50 = vld [vmem:[%s5072_s1 + $0x184] ss:$16 sps:$4 sm:$0xff]   ;;  %v3422_v52 = vld [vmem:[%s5072_s1 + $0x180] ss:$16 sps:$4 sm:$0xff]  }
  0x12   :  { %v36_v48 = vpack.c.bf16 %v29_v46, %v29_v46  ;;  %v3420_v51 = vld [vmem:[%s5072_s1 + $0x18c] ss:$16 sps:$4 sm:$0xff]   ;;  %v3423_v53 = vld [vmem:[%s5072_s1 + $0x188] ss:$16 sps:$4 sm:$0xff]   ;;  %v3424_v54 = vld [vmem:[%s5072_s1 + $0x1a4] ss:$16 sps:$4 sm:$0xff]  }
  0x13   :  { %1253 = vmatpush1.bf16.msra.mxu0 %v3374_v18  ;;  %1417 = vmatpush1.bf16.msra.mxu1 %v3375_v19  ;;  %v3426_v55 = vld [vmem:[%s5072_s1 + $0x1ac] ss:$16 sps:$4 sm:$0xff]   ;;  %v3428_v56 = vld [vmem:[%s5072_s1 + $0x1a0] ss:$16 sps:$4 sm:$0xff]   ;;  %v3429_v57 = vld [vmem:[%s5072_s1 + $0x1a8] ss:$16 sps:$4 sm:$0xff]  }
  0x14   :  { %1254 = vmatprep.subr.bf16.mxu0 %v3376_v20  ;;  %1418 = vmatprep.subr.bf16.mxu1 %v3378_v21  ;;  %v3430_v58 = vld [vmem:[%s5072_s1 + $0x1c4] ss:$16 sps:$4 sm:$0xff]   ;;  %v3432_v59 = vld [vmem:[%s5072_s1 + $0x1cc] ss:$16 sps:$4 sm:$0xff]   ;;  %v3434_v60 = vld [vmem:[%s5072_s1 + $0x1c0] ss:$16 sps:$4 sm:$0xff]  }
  0x15   :  { %1276 = vmatprep.mubr.bf16.mxu0 %v36_v48  ;;  %1440 = vmatprep.mubr.bf16.mxu1 %v36_v48  ;;  %v3435_v61 = vld [vmem:[%s5072_s1 + $0x1c8] ss:$16 sps:$4 sm:$0xff]   ;;  %v3436_v62 = vld [vmem:[%s5072_s1 + $0x1e4] ss:$16 sps:$4 sm:$0xff]   ;;  %v3438_v63 = vld [vmem:[%s5072_s1 + $0x1ec] ss:$16 sps:$4 sm:$0xff]  }
  0x16   :  { %v3440_v0 = vld [vmem:[%s5072_s1 + $0x1e0] ss:$16 sps:$4 sm:$0xff]   ;;  %v3441_v1 = vld [vmem:[%s5072_s1 + $0x1e8] ss:$16 sps:$4 sm:$0xff]   ;;  %v3444_v3 = vld [vmem:[%s5072_s1 + $0x204] ss:$16 sps:$4 sm:$0xff]  }
  0x17   :  { %1255 = vmatpush1.bf16.msra.mxu0 %v3380_v22  ;;  %1419 = vmatpush1.bf16.msra.mxu1 %v3381_v23  ;;  %v28_v2 = vld [vmem:[%s5071_s0] sm:$0xff]  ;;  %v3447_v4 = vld [vmem:[%s5072_s1 + $0x20c] ss:$16 sps:$4 sm:$0xff]   ;;  %v3445_v7 = vld [vmem:[%s5072_s1 + $0x208] ss:$16 sps:$4 sm:$0xff]  }
  0x18   :  { %1256 = vmatprep.subr.bf16.mxu0 %v3382_v24  ;;  %1420 = vmatprep.subr.bf16.mxu1 %v3384_v25  ;;  %v35_v5 = vpack.c.bf16 %v28_v2, %v28_v2  ;;  %v3442_v6 = vld [vmem:[%s5072_s1 + $0x200] ss:$16 sps:$4 sm:$0xff]   ;;  %v3450_v8 = vld [vmem:[%s5072_s1 + $0x224] ss:$16 sps:$4 sm:$0xff]   ;;  %v3453_v9 = vld [vmem:[%s5072_s1 + $0x22c] ss:$16 sps:$4 sm:$0xff]  }
  0x19   :  { %v3448_v10 = vld [vmem:[%s5072_s1 + $0x220] ss:$16 sps:$4 sm:$0xff]   ;;  %v3451_v11 = vld [vmem:[%s5072_s1 + $0x228] ss:$16 sps:$4 sm:$0xff]   ;;  %v3456_v12 = vld [vmem:[%s5072_s1 + $0x244] ss:$16 sps:$4 sm:$0xff]  }
  0x1a   :  { %v3459_v13 = vld [vmem:[%s5072_s1 + $0x24c] ss:$16 sps:$4 sm:$0xff]   ;;  %v3454_v14 = vld [vmem:[%s5072_s1 + $0x240] ss:$16 sps:$4 sm:$0xff]   ;;  %v3457_v15 = vld [vmem:[%s5072_s1 + $0x248] ss:$16 sps:$4 sm:$0xff]  }
  0x1b   :  { %1257 = vmatpush1.bf16.msra.mxu0 %v3386_v26  ;;  %1421 = vmatpush1.bf16.msra.mxu1 %v3387_v27  ;;  %v3462_v16 = vld [vmem:[%s5072_s1 + $0x264] ss:$16 sps:$4 sm:$0xff]   ;;  %v3465_v17 = vld [vmem:[%s5072_s1 + $0x26c] ss:$16 sps:$4 sm:$0xff]   ;;  %v3460_v18 = vld [vmem:[%s5072_s1 + $0x260] ss:$16 sps:$4 sm:$0xff]  }
  0x1c   :  { %1258 = vmatprep.subr.bf16.mxu0 %v3388_v28  ;;  %1422 = vmatprep.subr.bf16.mxu1 %v3390_v29  ;;  %v3463_v19 = vld [vmem:[%s5072_s1 + $0x268] ss:$16 sps:$4 sm:$0xff]   ;;  %v3468_v20 = vld [vmem:[%s5072_s1 + $0x284] ss:$16 sps:$4 sm:$0xff]   ;;  %v3471_v21 = vld [vmem:[%s5072_s1 + $0x28c] ss:$16 sps:$4 sm:$0xff]  }
  0x1d   :  { %v3466_v22 = vld [vmem:[%s5072_s1 + $0x280] ss:$16 sps:$4 sm:$0xff]   ;;  %v3469_v23 = vld [vmem:[%s5072_s1 + $0x288] ss:$16 sps:$4 sm:$0xff]   ;;  %v3474_v24 = vld [vmem:[%s5072_s1 + $0x2a4] ss:$16 sps:$4 sm:$0xff]  }
  0x1e   :  { %v3477_v25 = vld [vmem:[%s5072_s1 + $0x2ac] ss:$16 sps:$4 sm:$0xff]   ;;  %v3472_v26 = vld [vmem:[%s5072_s1 + $0x2a0] ss:$16 sps:$4 sm:$0xff]   ;;  %v3475_v27 = vld [vmem:[%s5072_s1 + $0x2a8] ss:$16 sps:$4 sm:$0xff]  }
  0x1f   :  { %1259 = vmatpush1.bf16.msra.mxu0 %v3392_v30  ;;  %1423 = vmatpush1.bf16.msra.mxu1 %v3393_v31  ;;  %v3480_v28 = vld [vmem:[%s5072_s1 + $0x2c4] ss:$16 sps:$4 sm:$0xff]   ;;  %v3483_v29 = vld [vmem:[%s5072_s1 + $0x2cc] ss:$16 sps:$4 sm:$0xff]   ;;  %v3478_v31 = vld [vmem:[%s5072_s1 + $0x2c0] ss:$16 sps:$4 sm:$0xff]  }
  0x20   :  { %1260 = vmatprep.subr.bf16.mxu0 %v3394_v32  ;;  %1424 = vmatprep.subr.bf16.mxu1 %v3396_v33  ;;  %v31_v30 = vld [vmem:[%s5071_s0 + $0x18] sm:$0xff]  ;;  %v3504_v46 = vld [vmem:[%s5072_s1 + $0x344] ss:$16 sps:$4 sm:$0xff]   ;;  %v3502_v48 = vld [vmem:[%s5072_s1 + $0x340] ss:$16 sps:$4 sm:$0xff]  }
  0x21   :  { %v38_v32 = vpack.c.bf16 %v31_v30, %v31_v30  ;;  %v3481_v33 = vld [vmem:[%s5072_s1 + $0x2c8] ss:$16 sps:$4 sm:$0xff]   ;;  %v3534_v2 = vld [vmem:[%s5072_s1 + $0x3e4] ss:$16 sps:$4 sm:$0xff]  }
  0x22   :  { %v3570_v30 = vld [vmem:[%s5072_s1 + $0x4a4] ss:$16 sps:$4 sm:$0xff]  }
  0x23   :  { %1261 = vmatpush1.bf16.msra.mxu0 %v3398_v34  ;;  %1425 = vmatpush1.bf16.msra.mxu1 %v3399_v35  ;;  %v3486_v34 = vld [vmem:[%s5072_s1 + $0x2e4] ss:$16 sps:$4 sm:$0xff]   ;;  %v3489_v35 = vld [vmem:[%s5072_s1 + $0x2ec] ss:$16 sps:$4 sm:$0xff]  }
  0x24   :  { %1262 = vmatprep.subr.bf16.mxu0 %v3400_v36  ;;  %1426 = vmatprep.subr.bf16.mxu1 %v3402_v37  ;;  %v3484_v36 = vld [vmem:[%s5072_s1 + $0x2e0] ss:$16 sps:$4 sm:$0xff]   ;;  %v3487_v37 = vld [vmem:[%s5072_s1 + $0x2e8] ss:$16 sps:$4 sm:$0xff]  }
  0x27   :  { %1263 = vmatpush1.bf16.msra.mxu0 %v3404_v38  ;;  %1427 = vmatpush1.bf16.msra.mxu1 %v3405_v39  ;;  %v3492_v38 = vld [vmem:[%s5072_s1 + $0x304] ss:$16 sps:$4 sm:$0xff]   ;;  %v3495_v39 = vld [vmem:[%s5072_s1 + $0x30c] ss:$16 sps:$4 sm:$0xff]  }
  0x28   :  { %1264 = vmatprep.subr.bf16.mxu0 %v3406_v40  ;;  %1428 = vmatprep.subr.bf16.mxu1 %v3408_v41  ;;  %v3490_v40 = vld [vmem:[%s5072_s1 + $0x300] ss:$16 sps:$4 sm:$0xff]   ;;  %v3493_v41 = vld [vmem:[%s5072_s1 + $0x308] ss:$16 sps:$4 sm:$0xff]  }
  0x2b   :  { %1265 = vmatpush1.bf16.msra.mxu0 %v3410_v42  ;;  %1429 = vmatpush1.bf16.msra.mxu1 %v3411_v43  ;;  %v3498_v42 = vld [vmem:[%s5072_s1 + $0x324] ss:$16 sps:$4 sm:$0xff]   ;;  %v3501_v43 = vld [vmem:[%s5072_s1 + $0x32c] ss:$16 sps:$4 sm:$0xff]  }
  0x2c   :  { %1266 = vmatprep.subr.bf16.mxu0 %v3412_v44  ;;  %1430 = vmatprep.subr.bf16.mxu1 %v3414_v45  ;;  %v3496_v44 = vld [vmem:[%s5072_s1 + $0x320] ss:$16 sps:$4 sm:$0xff]   ;;  %v3499_v45 = vld [vmem:[%s5072_s1 + $0x328] ss:$16 sps:$4 sm:$0xff]  }
  0x2f   :  { %1267 = vmatpush1.bf16.msra.mxu0 %v3416_v47  ;;  %1431 = vmatpush1.bf16.msra.mxu1 %v3417_v49  ;;  %v3507_v47 = vld [vmem:[%s5072_s1 + $0x34c] ss:$16 sps:$4 sm:$0xff]   ;;  %v3505_v49 = vld [vmem:[%s5072_s1 + $0x348] ss:$16 sps:$4 sm:$0xff]  }
  0x30   :  { %1268 = vmatprep.subr.bf16.mxu0 %v3418_v50  ;;  %1432 = vmatprep.subr.bf16.mxu1 %v3420_v51  ;;  %v3510_v50 = vld [vmem:[%s5072_s1 + $0x364] ss:$16 sps:$4 sm:$0xff]   ;;  %v3513_v51 = vld [vmem:[%s5072_s1 + $0x36c] ss:$16 sps:$4 sm:$0xff]  }
  0x33   :  { %1269 = vmatpush1.bf16.msra.mxu0 %v3422_v52  ;;  %1433 = vmatpush1.bf16.msra.mxu1 %v3423_v53  ;;  %v3508_v52 = vld [vmem:[%s5072_s1 + $0x360] ss:$16 sps:$4 sm:$0xff]   ;;  %v3511_v53 = vld [vmem:[%s5072_s1 + $0x368] ss:$16 sps:$4 sm:$0xff]  }
  0x34   :  { %1270 = vmatprep.subr.bf16.mxu0 %v3424_v54  ;;  %1434 = vmatprep.subr.bf16.mxu1 %v3426_v55  ;;  %v3516_v54 = vld [vmem:[%s5072_s1 + $0x384] ss:$16 sps:$4 sm:$0xff]   ;;  %v3519_v55 = vld [vmem:[%s5072_s1 + $0x38c] ss:$16 sps:$4 sm:$0xff]  }
  0x37   :  { %1271 = vmatpush1.bf16.msra.mxu0 %v3428_v56  ;;  %1435 = vmatpush1.bf16.msra.mxu1 %v3429_v57  ;;  %v3514_v56 = vld [vmem:[%s5072_s1 + $0x380] ss:$16 sps:$4 sm:$0xff]   ;;  %v3517_v57 = vld [vmem:[%s5072_s1 + $0x388] ss:$16 sps:$4 sm:$0xff]  }
  0x38   :  { %1272 = vmatprep.subr.bf16.mxu0 %v3430_v58  ;;  %1436 = vmatprep.subr.bf16.mxu1 %v3432_v59  ;;  %v3522_v58 = vld [vmem:[%s5072_s1 + $0x3a4] ss:$16 sps:$4 sm:$0xff]   ;;  %v3525_v59 = vld [vmem:[%s5072_s1 + $0x3ac] ss:$16 sps:$4 sm:$0xff]  }
  0x3b   :  { %1273 = vmatpush1.bf16.msra.mxu0 %v3434_v60  ;;  %1437 = vmatpush1.bf16.msra.mxu1 %v3435_v61  ;;  %v3520_v60 = vld [vmem:[%s5072_s1 + $0x3a0] ss:$16 sps:$4 sm:$0xff]   ;;  %v3523_v61 = vld [vmem:[%s5072_s1 + $0x3a8] ss:$16 sps:$4 sm:$0xff]  }
  0x3c   :  { %1274 = vmatprep.subr.bf16.mxu0 %v3436_v62  ;;  %1438 = vmatprep.subr.bf16.mxu1 %v3438_v63  ;;  %v3528_v62 = vld [vmem:[%s5072_s1 + $0x3c4] ss:$16 sps:$4 sm:$0xff]   ;;  %v3531_v63 = vld [vmem:[%s5072_s1 + $0x3cc] ss:$16 sps:$4 sm:$0xff]  }
  0x3f   :  { %1275 = vmatpush1.bf16.msra.mxu0 %v3440_v0  ;;  %1439 = vmatpush1.bf16.msra.mxu1 %v3441_v1  ;;  %v3526_v0 = vld [vmem:[%s5072_s1 + $0x3c0] ss:$16 sps:$4 sm:$0xff]   ;;  %v3529_v1 = vld [vmem:[%s5072_s1 + $0x3c8] ss:$16 sps:$4 sm:$0xff]  }
  0x40   :  { %1285 = vmatprep.subr.bf16.mxu0 %v3444_v3  ;;  %1449 = vmatprep.subr.bf16.mxu1 %v3447_v4  ;;  %v3537_v3 = vld [vmem:[%s5072_s1 + $0x3ec] ss:$16 sps:$4 sm:$0xff]   ;;  %v3532_v4 = vld [vmem:[%s5072_s1 + $0x3e0] ss:$16 sps:$4 sm:$0xff]  }
  0x42   :  { %1277 = vmatmul.mubr.bf16.vlgmr.msra.gmra.mrb[0].mxu0 %v35_v5  ;;  %1441 = vmatmul.mubr.bf16.vlgmr.msra.gmra.mrb[0].mxu1 %v35_v5  ;;  %v3535_v5 = vld [vmem:[%s5072_s1 + $0x3e8] ss:$16 sps:$4 sm:$0xff]  }
  0x43   :  { %1286 = vmatpush1.bf16.msra.mxu0 %v3442_v6  ;;  %1450 = vmatpush1.bf16.msra.mxu1 %v3445_v7  ;;  %v3540_v6 = vld [vmem:[%s5072_s1 + $0x404] ss:$16 sps:$4 sm:$0xff]  }
  0x44   :  { %1287 = vmatprep.subr.bf16.mxu0 %v3450_v8  ;;  %1451 = vmatprep.subr.bf16.mxu1 %v3453_v9  ;;  %v30_v7 = vld [vmem:[%s5071_s0 + $0x10] sm:$0xff]  ;;  %v3543_v8 = vld [vmem:[%s5072_s1 + $0x40c] ss:$16 sps:$4 sm:$0xff]  }
  0x45   :  { %1317 = vmatprep.mubr.bf16.mxu0 %v38_v32  ;;  %1481 = vmatprep.mubr.bf16.mxu1 %v38_v32  ;;  %v3538_v9 = vld [vmem:[%s5072_s1 + $0x400] ss:$16 sps:$4 sm:$0xff]  }
  0x46   :  { %v3568_v32 = vld [vmem:[%s5072_s1 + $0x4a0] ss:$16 sps:$4 sm:$0xff]  }
  0x47   :  { %1288 = vmatpush1.bf16.msra.mxu0 %v3448_v10  ;;  %1452 = vmatpush1.bf16.msra.mxu1 %v3451_v11  ;;  %v37_v10 = vpack.c.bf16 %v30_v7, %v30_v7  ;;  %v3541_v11 = vld [vmem:[%s5072_s1 + $0x408] ss:$16 sps:$4 sm:$0xff]   ;;  %v3633_v7 = vld [vmem:[%s5072_s1 + $0x5ec] ss:$16 sps:$4 sm:$0xff]  }
  0x48   :  { %1289 = vmatprep.subr.bf16.mxu0 %v3456_v12  ;;  %1453 = vmatprep.subr.bf16.mxu1 %v3459_v13  ;;  %v3546_v12 = vld [vmem:[%s5072_s1 + $0x424] ss:$16 sps:$4 sm:$0xff]   ;;  %v3549_v13 = vld [vmem:[%s5072_s1 + $0x42c] ss:$16 sps:$4 sm:$0xff]  }
  0x4b   :  { %1290 = vmatpush1.bf16.msra.mxu0 %v3454_v14  ;;  %1454 = vmatpush1.bf16.msra.mxu1 %v3457_v15  ;;  %v33_v14 = vld [vmem:[%s5071_s0 + $0x28] sm:$0xff] }
  0x4c   :  { %1291 = vmatprep.subr.bf16.mxu0 %v3462_v16  ;;  %1455 = vmatprep.subr.bf16.mxu1 %v3465_v17  ;;  %v40_v15 = vpack.c.bf16 %v33_v14, %v33_v14  ;;  %v3544_v16 = vld [vmem:[%s5072_s1 + $0x420] ss:$16 sps:$4 sm:$0xff]   ;;  %v3547_v17 = vld [vmem:[%s5072_s1 + $0x428] ss:$16 sps:$4 sm:$0xff]  }
  0x4d   :  { %v3637_v14 = vld [vmem:[%s5072_s1 + $0x608] ss:$16 sps:$4 sm:$0xff]  }
  0x4f   :  { %1292 = vmatpush1.bf16.msra.mxu0 %v3460_v18  ;;  %1456 = vmatpush1.bf16.msra.mxu1 %v3463_v19  ;;  %v3552_v18 = vld [vmem:[%s5072_s1 + $0x444] ss:$16 sps:$4 sm:$0xff]   ;;  %v3555_v19 = vld [vmem:[%s5072_s1 + $0x44c] ss:$16 sps:$4 sm:$0xff]  }
  0x50   :  { %1293 = vmatprep.subr.bf16.mxu0 %v3468_v20  ;;  %1457 = vmatprep.subr.bf16.mxu1 %v3471_v21  ;;  %v3550_v20 = vld [vmem:[%s5072_s1 + $0x440] ss:$16 sps:$4 sm:$0xff]   ;;  %v3553_v21 = vld [vmem:[%s5072_s1 + $0x448] ss:$16 sps:$4 sm:$0xff]  }
  0x53   :  { %1294 = vmatpush1.bf16.msra.mxu0 %v3466_v22  ;;  %1458 = vmatpush1.bf16.msra.mxu1 %v3469_v23  ;;  %v3558_v22 = vld [vmem:[%s5072_s1 + $0x464] ss:$16 sps:$4 sm:$0xff]   ;;  %v3561_v23 = vld [vmem:[%s5072_s1 + $0x46c] ss:$16 sps:$4 sm:$0xff]  }
  0x54   :  { %1295 = vmatprep.subr.bf16.mxu0 %v3474_v24  ;;  %1459 = vmatprep.subr.bf16.mxu1 %v3477_v25  ;;  %v3556_v24 = vld [vmem:[%s5072_s1 + $0x460] ss:$16 sps:$4 sm:$0xff]   ;;  %v3559_v25 = vld [vmem:[%s5072_s1 + $0x468] ss:$16 sps:$4 sm:$0xff]  }
  0x57   :  { %1296 = vmatpush1.bf16.msra.mxu0 %v3472_v26  ;;  %1460 = vmatpush1.bf16.msra.mxu1 %v3475_v27  ;;  %v3564_v26 = vld [vmem:[%s5072_s1 + $0x484] ss:$16 sps:$4 sm:$0xff]   ;;  %v3567_v27 = vld [vmem:[%s5072_s1 + $0x48c] ss:$16 sps:$4 sm:$0xff]  }
  0x58   :  { %1297 = vmatprep.subr.bf16.mxu0 %v3480_v28  ;;  %1461 = vmatprep.subr.bf16.mxu1 %v3483_v29  ;;  %v3562_v28 = vld [vmem:[%s5072_s1 + $0x480] ss:$16 sps:$4 sm:$0xff]   ;;  %v3565_v29 = vld [vmem:[%s5072_s1 + $0x488] ss:$16 sps:$4 sm:$0xff]  }
  0x5b   :  { %1298 = vmatpush1.bf16.msra.mxu0 %v3478_v31  ;;  %1462 = vmatpush1.bf16.msra.mxu1 %v3481_v33  ;;  %v3573_v31 = vld [vmem:[%s5072_s1 + $0x4ac] ss:$16 sps:$4 sm:$0xff]   ;;  %v3571_v33 = vld [vmem:[%s5072_s1 + $0x4a8] ss:$16 sps:$4 sm:$0xff]  }
  0x5c   :  { %1299 = vmatprep.subr.bf16.mxu0 %v3486_v34  ;;  %1463 = vmatprep.subr.bf16.mxu1 %v3489_v35  ;;  %v3576_v34 = vld [vmem:[%s5072_s1 + $0x4c4] ss:$16 sps:$4 sm:$0xff]   ;;  %v3579_v35 = vld [vmem:[%s5072_s1 + $0x4cc] ss:$16 sps:$4 sm:$0xff]  }
  0x5f   :  { %1300 = vmatpush1.bf16.msra.mxu0 %v3484_v36  ;;  %1464 = vmatpush1.bf16.msra.mxu1 %v3487_v37  ;;  %v3574_v36 = vld [vmem:[%s5072_s1 + $0x4c0] ss:$16 sps:$4 sm:$0xff]   ;;  %v3577_v37 = vld [vmem:[%s5072_s1 + $0x4c8] ss:$16 sps:$4 sm:$0xff]  }
  0x60   :  { %1301 = vmatprep.subr.bf16.mxu0 %v3492_v38  ;;  %1465 = vmatprep.subr.bf16.mxu1 %v3495_v39  ;;  %v3582_v38 = vld [vmem:[%s5072_s1 + $0x4e4] ss:$16 sps:$4 sm:$0xff]   ;;  %v3585_v39 = vld [vmem:[%s5072_s1 + $0x4ec] ss:$16 sps:$4 sm:$0xff]  }
  0x63   :  { %1302 = vmatpush1.bf16.msra.mxu0 %v3490_v40  ;;  %1466 = vmatpush1.bf16.msra.mxu1 %v3493_v41  ;;  %v3580_v40 = vld [vmem:[%s5072_s1 + $0x4e0] ss:$16 sps:$4 sm:$0xff]   ;;  %v3583_v41 = vld [vmem:[%s5072_s1 + $0x4e8] ss:$16 sps:$4 sm:$0xff]  }
  0x64   :  { %1303 = vmatprep.subr.bf16.mxu0 %v3498_v42  ;;  %1467 = vmatprep.subr.bf16.mxu1 %v3501_v43  ;;  %v3588_v42 = vld [vmem:[%s5072_s1 + $0x504] ss:$16 sps:$4 sm:$0xff]   ;;  %v3591_v43 = vld [vmem:[%s5072_s1 + $0x50c] ss:$16 sps:$4 sm:$0xff]  }
  0x67   :  { %1304 = vmatpush1.bf16.msra.mxu0 %v3496_v44  ;;  %1468 = vmatpush1.bf16.msra.mxu1 %v3499_v45  ;;  %v3586_v44 = vld [vmem:[%s5072_s1 + $0x500] ss:$16 sps:$4 sm:$0xff]   ;;  %v3589_v45 = vld [vmem:[%s5072_s1 + $0x508] ss:$16 sps:$4 sm:$0xff]  }
  0x68   :  { %1305 = vmatprep.subr.bf16.mxu0 %v3504_v46  ;;  %1469 = vmatprep.subr.bf16.mxu1 %v3507_v47  ;;  %v3594_v46 = vld [vmem:[%s5072_s1 + $0x524] ss:$16 sps:$4 sm:$0xff]   ;;  %v3597_v47 = vld [vmem:[%s5072_s1 + $0x52c] ss:$16 sps:$4 sm:$0xff]  }
  0x6b   :  { %1306 = vmatpush1.bf16.msra.mxu0 %v3502_v48  ;;  %1470 = vmatpush1.bf16.msra.mxu1 %v3505_v49  ;;  %v3592_v48 = vld [vmem:[%s5072_s1 + $0x520] ss:$16 sps:$4 sm:$0xff]   ;;  %v3595_v49 = vld [vmem:[%s5072_s1 + $0x528] ss:$16 sps:$4 sm:$0xff]  }
  0x6c   :  { %1307 = vmatprep.subr.bf16.mxu0 %v3510_v50  ;;  %1471 = vmatprep.subr.bf16.mxu1 %v3513_v51  ;;  %v3600_v50 = vld [vmem:[%s5072_s1 + $0x544] ss:$16 sps:$4 sm:$0xff]   ;;  %v3603_v51 = vld [vmem:[%s5072_s1 + $0x54c] ss:$16 sps:$4 sm:$0xff]  }
  0x6f   :  { %1308 = vmatpush1.bf16.msra.mxu0 %v3508_v52  ;;  %1472 = vmatpush1.bf16.msra.mxu1 %v3511_v53  ;;  %v3598_v52 = vld [vmem:[%s5072_s1 + $0x540] ss:$16 sps:$4 sm:$0xff]   ;;  %v3601_v53 = vld [vmem:[%s5072_s1 + $0x548] ss:$16 sps:$4 sm:$0xff]  }
  0x70   :  { %1309 = vmatprep.subr.bf16.mxu0 %v3516_v54  ;;  %1473 = vmatprep.subr.bf16.mxu1 %v3519_v55  ;;  %v3606_v54 = vld [vmem:[%s5072_s1 + $0x564] ss:$16 sps:$4 sm:$0xff]   ;;  %v3609_v55 = vld [vmem:[%s5072_s1 + $0x56c] ss:$16 sps:$4 sm:$0xff]  }
  0x73   :  { %1310 = vmatpush1.bf16.msra.mxu0 %v3514_v56  ;;  %1474 = vmatpush1.bf16.msra.mxu1 %v3517_v57  ;;  %v3604_v56 = vld [vmem:[%s5072_s1 + $0x560] ss:$16 sps:$4 sm:$0xff]   ;;  %v3607_v57 = vld [vmem:[%s5072_s1 + $0x568] ss:$16 sps:$4 sm:$0xff]  }
  0x74   :  { %1311 = vmatprep.subr.bf16.mxu0 %v3522_v58  ;;  %1475 = vmatprep.subr.bf16.mxu1 %v3525_v59  ;;  %v3612_v58 = vld [vmem:[%s5072_s1 + $0x584] ss:$16 sps:$4 sm:$0xff]   ;;  %v3615_v59 = vld [vmem:[%s5072_s1 + $0x58c] ss:$16 sps:$4 sm:$0xff]  }
  0x77   :  { %1312 = vmatpush1.bf16.msra.mxu0 %v3520_v60  ;;  %1476 = vmatpush1.bf16.msra.mxu1 %v3523_v61  ;;  %v3610_v60 = vld [vmem:[%s5072_s1 + $0x580] ss:$16 sps:$4 sm:$0xff]   ;;  %v3613_v61 = vld [vmem:[%s5072_s1 + $0x588] ss:$16 sps:$4 sm:$0xff]  }
  0x78   :  { %1313 = vmatprep.subr.bf16.mxu0 %v3528_v62  ;;  %1477 = vmatprep.subr.bf16.mxu1 %v3531_v63  ;;  %v3618_v62 = vld [vmem:[%s5072_s1 + $0x5a4] ss:$16 sps:$4 sm:$0xff]   ;;  %v3621_v63 = vld [vmem:[%s5072_s1 + $0x5ac] ss:$16 sps:$4 sm:$0xff]  }
  0x7b   :  { %1314 = vmatpush1.bf16.msra.mxu0 %v3526_v0  ;;  %1478 = vmatpush1.bf16.msra.mxu1 %v3529_v1  ;;  %v3616_v0 = vld [vmem:[%s5072_s1 + $0x5a0] ss:$16 sps:$4 sm:$0xff]   ;;  %v3619_v1 = vld [vmem:[%s5072_s1 + $0x5a8] ss:$16 sps:$4 sm:$0xff]  }
  0x7c   :  { %1315 = vmatprep.subr.bf16.mxu0 %v3534_v2  ;;  %1479 = vmatprep.subr.bf16.mxu1 %v3537_v3  ;;  %v3624_v2 = vld [vmem:[%s5072_s1 + $0x5c4] ss:$16 sps:$4 sm:$0xff]   ;;  %v3627_v3 = vld [vmem:[%s5072_s1 + $0x5cc] ss:$16 sps:$4 sm:$0xff]  }
  0x7f   :  { %1316 = vmatpush1.bf16.msra.mxu0 %v3532_v4  ;;  %1480 = vmatpush1.bf16.msra.mxu1 %v3535_v5  ;;  %v3622_v4 = vld [vmem:[%s5072_s1 + $0x5c0] ss:$16 sps:$4 sm:$0xff]   ;;  %v3625_v5 = vld [vmem:[%s5072_s1 + $0x5c8] ss:$16 sps:$4 sm:$0xff]  }
  0x80   :  { %1326 = vmatprep.subr.bf16.mxu0 %v3540_v6  ;;  %1490 = vmatprep.subr.bf16.mxu1 %v3543_v8  ;;  %v3630_v6 = vld [vmem:[%s5072_s1 + $0x5e4] ss:$16 sps:$4 sm:$0xff]   ;;  %v3628_v8 = vld [vmem:[%s5072_s1 + $0x5e0] ss:$16 sps:$4 sm:$0xff]  }
  0x82   :  { %1318 = vmatmul.mubr.bf16.vlgmr.msra.gmra.mrb[0].mxu0 %v37_v10  ;;  %1482 = vmatmul.mubr.bf16.vlgmr.msra.gmra.mrb[0].mxu1 %v37_v10  ;;  %v32_v10 = vld [vmem:[%s5071_s0 + $0x20] sm:$0xff] }
  0x83   :  { %1327 = vmatpush1.bf16.msra.mxu0 %v3538_v9  ;;  %1491 = vmatpush1.bf16.msra.mxu1 %v3541_v11  ;;  %v3631_v9 = vld [vmem:[%s5072_s1 + $0x5e8] ss:$16 sps:$4 sm:$0xff]   ;;  %v3636_v11 = vld [vmem:[%s5072_s1 + $0x604] ss:$16 sps:$4 sm:$0xff]  }
  0x84   :  { %1328 = vmatprep.subr.bf16.mxu0 %v3546_v12  ;;  %1492 = vmatprep.subr.bf16.mxu1 %v3549_v13  ;;  %v3639_v12 = vld [vmem:[%s5072_s1 + $0x60c] ss:$16 sps:$4 sm:$0xff]   ;;  %v3634_v13 = vld [vmem:[%s5072_s1 + $0x600] ss:$16 sps:$4 sm:$0xff]  }
  0x85   :  { %1358 = vmatprep.mubr.bf16.mxu0 %v40_v15  ;;  %1522 = vmatprep.mubr.bf16.mxu1 %v40_v15  ;;  %v39_v15 = vpack.c.bf16 %v32_v10, %v32_v10 }
  0x87   :  { %1329 = vmatpush1.bf16.msra.mxu0 %v3544_v16  ;;  %1493 = vmatpush1.bf16.msra.mxu1 %v3547_v17  ;;  %v3642_v16 = vld [vmem:[%s5074_s3 + $0x4] ss:$16 sps:$4 sm:$0xff]   ;;  %v3645_v17 = vld [vmem:[%s5074_s3 + $0xc] ss:$16 sps:$4 sm:$0xff]  }
  0x88   :  { %1330 = vmatprep.subr.bf16.mxu0 %v3552_v18  ;;  %1494 = vmatprep.subr.bf16.mxu1 %v3555_v19  ;;  %v3888_v18 = vmov 0   ;;  %v34_v19 = vld [vmem:[%s5071_s0 + $0x30] sm:$0xff] }
  0x8b   :  { %1331 = vmatpush1.bf16.msra.mxu0 %v3550_v20  ;;  %1495 = vmatpush1.bf16.msra.mxu1 %v3553_v21  ;;  %v3640_v20 = vld [vmem:[%s5074_s3] ss:$16 sps:$4 sm:$0xff]   ;;  %v3643_v21 = vld [vmem:[%s5074_s3 + $0x8] ss:$16 sps:$4 sm:$0xff]  }
  0x8c   :  { %1332 = vmatprep.subr.bf16.mxu0 %v3558_v22  ;;  %1496 = vmatprep.subr.bf16.mxu1 %v3561_v23  ;;  %v41_v22 = vpack.c.bf16 %v34_v19, %v34_v19  ;;  %v3648_v23 = vld [vmem:[%s5074_s3 + $0x24] ss:$16 sps:$4 sm:$0xff]  }
  0x8f   :  { %1333 = vmatpush1.bf16.msra.mxu0 %v3556_v24  ;;  %1497 = vmatpush1.bf16.msra.mxu1 %v3559_v25  ;;  %v3651_v24 = vld [vmem:[%s5074_s3 + $0x2c] ss:$16 sps:$4 sm:$0xff]   ;;  %v3646_v25 = vld [vmem:[%s5074_s3 + $0x20] ss:$16 sps:$4 sm:$0xff]  }
  0x90   :  { %1334 = vmatprep.subr.bf16.mxu0 %v3564_v26  ;;  %1498 = vmatprep.subr.bf16.mxu1 %v3567_v27  ;;  %v3649_v26 = vld [vmem:[%s5074_s3 + $0x28] ss:$16 sps:$4 sm:$0xff]   ;;  %v3654_v27 = vld [vmem:[%s5074_s3 + $0x44] ss:$16 sps:$4 sm:$0xff]  }
  0x93   :  { %1335 = vmatpush1.bf16.msra.mxu0 %v3562_v28  ;;  %1499 = vmatpush1.bf16.msra.mxu1 %v3565_v29  ;;  %v3657_v28 = vld [vmem:[%s5074_s3 + $0x4c] ss:$16 sps:$4 sm:$0xff]   ;;  %v3652_v29 = vld [vmem:[%s5074_s3 + $0x40] ss:$16 sps:$4 sm:$0xff]  }
  0x94   :  { %1336 = vmatprep.subr.bf16.mxu0 %v3570_v30  ;;  %1500 = vmatprep.subr.bf16.mxu1 %v3573_v31  ;;  %v3655_v30 = vld [vmem:[%s5074_s3 + $0x48] ss:$16 sps:$4 sm:$0xff]   ;;  %v3660_v31 = vld [vmem:[%s5074_s3 + $0x64] ss:$16 sps:$4 sm:$0xff]  }
  0x97   :  { %1337 = vmatpush1.bf16.msra.mxu0 %v3568_v32  ;;  %1501 = vmatpush1.bf16.msra.mxu1 %v3571_v33  ;;  %v3663_v32 = vld [vmem:[%s5074_s3 + $0x6c] ss:$16 sps:$4 sm:$0xff]   ;;  %v3658_v33 = vld [vmem:[%s5074_s3 + $0x60] ss:$16 sps:$4 sm:$0xff]  }
  0x98   :  { %1338 = vmatprep.subr.bf16.mxu0 %v3576_v34  ;;  %1502 = vmatprep.subr.bf16.mxu1 %v3579_v35  ;;  %v3661_v34 = vld [vmem:[%s5074_s3 + $0x68] ss:$16 sps:$4 sm:$0xff]  }
  0x9b   :  { %1339 = vmatpush1.bf16.msra.mxu0 %v3574_v36  ;;  %1503 = vmatpush1.bf16.msra.mxu1 %v3577_v37 }
  0x9c   :  { %1340 = vmatprep.subr.bf16.mxu0 %v3582_v38  ;;  %1504 = vmatprep.subr.bf16.mxu1 %v3585_v39 }
  0x9f   :  { %1341 = vmatpush1.bf16.msra.mxu0 %v3580_v40  ;;  %1505 = vmatpush1.bf16.msra.mxu1 %v3583_v41 }
  0xa0   :  { %1342 = vmatprep.subr.bf16.mxu0 %v3588_v42  ;;  %1506 = vmatprep.subr.bf16.mxu1 %v3591_v43 }
  0xa3   :  { %1343 = vmatpush1.bf16.msra.mxu0 %v3586_v44  ;;  %1507 = vmatpush1.bf16.msra.mxu1 %v3589_v45 }
  0xa4   :  { %1344 = vmatprep.subr.bf16.mxu0 %v3594_v46  ;;  %1508 = vmatprep.subr.bf16.mxu1 %v3597_v47 }
  0xa7   :  { %1345 = vmatpush1.bf16.msra.mxu0 %v3592_v48  ;;  %1509 = vmatpush1.bf16.msra.mxu1 %v3595_v49 }
  0xa8   :  { %1346 = vmatprep.subr.bf16.mxu0 %v3600_v50  ;;  %1510 = vmatprep.subr.bf16.mxu1 %v3603_v51 }
  0xab   :  { %1347 = vmatpush1.bf16.msra.mxu0 %v3598_v52  ;;  %1511 = vmatpush1.bf16.msra.mxu1 %v3601_v53 }
  0xac   :  { %1348 = vmatprep.subr.bf16.mxu0 %v3606_v54  ;;  %1512 = vmatprep.subr.bf16.mxu1 %v3609_v55 }
  0xaf   :  { %1349 = vmatpush1.bf16.msra.mxu0 %v3604_v56  ;;  %1513 = vmatpush1.bf16.msra.mxu1 %v3607_v57 }
  0xb0   :  { %1350 = vmatprep.subr.bf16.mxu0 %v3612_v58  ;;  %1514 = vmatprep.subr.bf16.mxu1 %v3615_v59 }
  0xb3   :  { %1351 = vmatpush1.bf16.msra.mxu0 %v3610_v60  ;;  %1515 = vmatpush1.bf16.msra.mxu1 %v3613_v61 }
  0xb4   :  { %1352 = vmatprep.subr.bf16.mxu0 %v3618_v62  ;;  %1516 = vmatprep.subr.bf16.mxu1 %v3621_v63 }
  0xb7   :  { %1353 = vmatpush1.bf16.msra.mxu0 %v3616_v0  ;;  %1517 = vmatpush1.bf16.msra.mxu1 %v3619_v1 }
  0xb8   :  { %1354 = vmatprep.subr.bf16.mxu0 %v3624_v2  ;;  %1518 = vmatprep.subr.bf16.mxu1 %v3627_v3 }
  0xbb   :  { %1355 = vmatpush1.bf16.msra.mxu0 %v3622_v4  ;;  %1519 = vmatpush1.bf16.msra.mxu1 %v3625_v5 }
  0xbc   :  { %1356 = vmatprep.subr.bf16.mxu0 %v3630_v6  ;;  %1520 = vmatprep.subr.bf16.mxu1 %v3633_v7 }
  0xbf   :  { %1357 = vmatpush1.bf16.msra.mxu0 %v3628_v8  ;;  %1521 = vmatpush1.bf16.msra.mxu1 %v3631_v9 }
  0xc0   :  { %1367 = vmatprep.subr.bf16.mxu0 %v3636_v11  ;;  %1531 = vmatprep.subr.bf16.mxu1 %v3639_v12 }
  0xc2   :  { %1359 = vmatmul.mubr.bf16.vlgmr.msra.gmra.mrb[0].mxu0 %v39_v15  ;;  %1523 = vmatmul.mubr.bf16.vlgmr.msra.gmra.mrb[0].mxu1 %v39_v15 }
  0xc3   :  { %1368 = vmatpush1.bf16.msra.mxu0 %v3634_v13  ;;  %1532 = vmatpush1.bf16.msra.mxu1 %v3637_v14 }
  0xc4   :  { %1399 = vmatprep.mubr.bf16.mxu0 %v3888_v18  ;;  %1563 = vmatprep.mubr.bf16.mxu1 %v3888_v18 }
  0xc5   :  { %2370 = vmatprep.subr.bf16.mxu0 %v3642_v16  ;;  %2452 = vmatprep.subr.bf16.mxu1 %v3645_v17 }
  0xce   :  { %3097 = vmatmul.mubr.msk.bf16.vlgmr.msra.gmra.mrb[0].mxu0 %vm1240_vm0, %v41_v22  ;;  %3098 = vmatmul.mubr.msk.bf16.vlgmr.msra.gmra.mrb[0].mxu1 %vm1240_vm0, %v41_v22 }
  0xcf   :  { %2371 = vmatpush1.bf16.msra.mxu0 %v3640_v20  ;;  %2453 = vmatpush1.bf16.msra.mxu1 %v3643_v21 }
  0xd0   :  { %2372 = vmatprep.subr.bf16.mxu0 %v3648_v23  ;;  %2454 = vmatprep.subr.bf16.mxu1 %v3651_v24 }
  0xd3   :  { %2373 = vmatpush1.bf16.msra.mxu0 %v3646_v25  ;;  %2455 = vmatpush1.bf16.msra.mxu1 %v3649_v26 }
  0xd4   :  { %2374 = vmatprep.subr.bf16.mxu0 %v3654_v27  ;;  %2456 = vmatprep.subr.bf16.mxu1 %v3657_v28 }
  0xd7   :  { %2375 = vmatpush1.bf16.msra.mxu0 %v3652_v29  ;;  %2457 = vmatpush1.bf16.msra.mxu1 %v3655_v30 }
  0xd8   :  { %12 = vsyncpa [#allocation3], 0  ;;  %2376 = vmatprep.subr.bf16.mxu0 %v3660_v31  ;;  %2458 = vmatprep.subr.bf16.mxu1 %v3663_v32  ;;  %v3666_v35 = vld [vmem:[%s5074_s3 + $0x84] ss:$16 sps:$4 sm:$0xff]   ;;  %v3669_v36 = vld [vmem:[%s5074_s3 + $0x8c] ss:$16 sps:$4 sm:$0xff]   ;;  %v240_v21 = vlaneseq }
  0xd9   :  { %v3664_v37 = vld [vmem:[%s5074_s3 + $0x80] ss:$16 sps:$4 sm:$0xff]   ;;  %v3667_v38 = vld [vmem:[%s5074_s3 + $0x88] ss:$16 sps:$4 sm:$0xff]   ;;  %v3672_v39 = vld [vmem:[%s5074_s3 + $0xa4] ss:$16 sps:$4 sm:$0xff]  }
  0xda   :  { %v3675_v40 = vld [vmem:[%s5074_s3 + $0xac] ss:$16 sps:$4 sm:$0xff]   ;;  %v3670_v41 = vld [vmem:[%s5074_s3 + $0xa0] ss:$16 sps:$4 sm:$0xff]   ;;  %v3673_v42 = vld [vmem:[%s5074_s3 + $0xa8] ss:$16 sps:$4 sm:$0xff]  }
  0xdb   :  { %2377 = vmatpush1.bf16.msra.mxu0 %v3658_v33  ;;  %2459 = vmatpush1.bf16.msra.mxu1 %v3661_v34  ;;  %v3678_v43 = vld [vmem:[%s5074_s3 + $0xc4] ss:$16 sps:$4 sm:$0xff]   ;;  %v3681_v44 = vld [vmem:[%s5074_s3 + $0xcc] ss:$16 sps:$4 sm:$0xff]   ;;  %v3676_v45 = vld [vmem:[%s5074_s3 + $0xc0] ss:$16 sps:$4 sm:$0xff]  }
  0xdc   :  { %2378 = vmatprep.subr.bf16.mxu0 %v3666_v35  ;;  %2460 = vmatprep.subr.bf16.mxu1 %v3669_v36  ;;  %v3679_v46 = vld [vmem:[%s5074_s3 + $0xc8] ss:$16 sps:$4 sm:$0xff]   ;;  %v3684_v47 = vld [vmem:[%s5074_s3 + $0xe4] ss:$16 sps:$4 sm:$0xff]   ;;  %v3687_v48 = vld [vmem:[%s5074_s3 + $0xec] ss:$16 sps:$4 sm:$0xff]  }
  0xdd   :  { %v3682_v49 = vld [vmem:[%s5074_s3 + $0xe0] ss:$16 sps:$4 sm:$0xff]   ;;  %v3685_v50 = vld [vmem:[%s5074_s3 + $0xe8] ss:$16 sps:$4 sm:$0xff]   ;;  %v3690_v51 = vld [vmem:[%s5074_s3 + $0x104] ss:$16 sps:$4 sm:$0xff]  }
  0xde   :  { %v3693_v52 = vld [vmem:[%s5074_s3 + $0x10c] ss:$16 sps:$4 sm:$0xff]   ;;  %v3688_v53 = vld [vmem:[%s5074_s3 + $0x100] ss:$16 sps:$4 sm:$0xff]   ;;  %v3691_v54 = vld [vmem:[%s5074_s3 + $0x108] ss:$16 sps:$4 sm:$0xff]  }
  0xdf   :  { %2379 = vmatpush1.bf16.msra.mxu0 %v3664_v37  ;;  %2461 = vmatpush1.bf16.msra.mxu1 %v3667_v38  ;;  %v3696_v55 = vld [vmem:[%s5074_s3 + $0x124] ss:$16 sps:$4 sm:$0xff]   ;;  %v3699_v56 = vld [vmem:[%s5074_s3 + $0x12c] ss:$16 sps:$4 sm:$0xff]   ;;  %v3694_v57 = vld [vmem:[%s5074_s3 + $0x120] ss:$16 sps:$4 sm:$0xff]  }
  0xe0   :  { %2380 = vmatprep.subr.bf16.mxu0 %v3672_v39  ;;  %2462 = vmatprep.subr.bf16.mxu1 %v3675_v40  ;;  %v3697_v58 = vld [vmem:[%s5074_s3 + $0x128] ss:$16 sps:$4 sm:$0xff]   ;;  %v3702_v59 = vld [vmem:[%s5074_s3 + $0x144] ss:$16 sps:$4 sm:$0xff]   ;;  %v3705_v60 = vld [vmem:[%s5074_s3 + $0x14c] ss:$16 sps:$4 sm:$0xff]  }
  0xe1   :  { %v3700_v61 = vld [vmem:[%s5074_s3 + $0x140] ss:$16 sps:$4 sm:$0xff]   ;;  %v3703_v62 = vld [vmem:[%s5074_s3 + $0x148] ss:$16 sps:$4 sm:$0xff]   ;;  %v3708_v63 = vld [vmem:[%s5074_s3 + $0x164] ss:$16 sps:$4 sm:$0xff]  }
  0xe2   :  { %v3711_v0 = vld [vmem:[%s5074_s3 + $0x16c] ss:$16 sps:$4 sm:$0xff]   ;;  %v3706_v1 = vld [vmem:[%s5074_s3 + $0x160] ss:$16 sps:$4 sm:$0xff]   ;;  %v3709_v2 = vld [vmem:[%s5074_s3 + $0x168] ss:$16 sps:$4 sm:$0xff]  }
  0xe3   :  { %2381 = vmatpush1.bf16.msra.mxu0 %v3670_v41  ;;  %2463 = vmatpush1.bf16.msra.mxu1 %v3673_v42  ;;  %v3714_v3 = vld [vmem:[%s5074_s3 + $0x184] ss:$16 sps:$4 sm:$0xff]   ;;  %v3717_v4 = vld [vmem:[%s5074_s3 + $0x18c] ss:$16 sps:$4 sm:$0xff]   ;;  %v3712_v5 = vld [vmem:[%s5074_s3 + $0x180] ss:$16 sps:$4 sm:$0xff]  }
  0xe4   :  { %2382 = vmatprep.subr.bf16.mxu0 %v3678_v43  ;;  %2464 = vmatprep.subr.bf16.mxu1 %v3681_v44  ;;  %v3715_v6 = vld [vmem:[%s5074_s3 + $0x188] ss:$16 sps:$4 sm:$0xff]   ;;  %v3720_v7 = vld [vmem:[%s5074_s3 + $0x1a4] ss:$16 sps:$4 sm:$0xff]   ;;  %v3723_v8 = vld [vmem:[%s5074_s3 + $0x1ac] ss:$16 sps:$4 sm:$0xff]  }
  0xe5   :  { %v3718_v9 = vld [vmem:[%s5074_s3 + $0x1a0] ss:$16 sps:$4 sm:$0xff]   ;;  %v3721_v10 = vld [vmem:[%s5074_s3 + $0x1a8] ss:$16 sps:$4 sm:$0xff]   ;;  %v3726_v11 = vld [vmem:[%s5074_s3 + $0x1c4] ss:$16 sps:$4 sm:$0xff]  }
  0xe6   :  { %v3729_v12 = vld [vmem:[%s5074_s3 + $0x1cc] ss:$16 sps:$4 sm:$0xff]   ;;  %v3724_v13 = vld [vmem:[%s5074_s3 + $0x1c0] ss:$16 sps:$4 sm:$0xff]   ;;  %v3727_v14 = vld [vmem:[%s5074_s3 + $0x1c8] ss:$16 sps:$4 sm:$0xff]  }
  0xe7   :  { %2383 = vmatpush1.bf16.msra.mxu0 %v3676_v45  ;;  %2465 = vmatpush1.bf16.msra.mxu1 %v3679_v46  ;;  %v3732_v15 = vld [vmem:[%s5074_s3 + $0x1e4] ss:$16 sps:$4 sm:$0xff]   ;;  %v3735_v16 = vld [vmem:[%s5074_s3 + $0x1ec] ss:$16 sps:$4 sm:$0xff]   ;;  %v3730_v17 = vld [vmem:[%s5074_s3 + $0x1e0] ss:$16 sps:$4 sm:$0xff]  }
  0xe8   :  { %2384 = vmatprep.subr.bf16.mxu0 %v3684_v47  ;;  %2466 = vmatprep.subr.bf16.mxu1 %v3687_v48  ;;  %v3733_v18 = vld [vmem:[%s5074_s3 + $0x1e8] ss:$16 sps:$4 sm:$0xff]   ;;  %v3738_v19 = vld [vmem:[%s5074_s3 + $0x204] ss:$16 sps:$4 sm:$0xff]   ;;  %v3741_v20 = vld [vmem:[%s5074_s3 + $0x20c] ss:$16 sps:$4 sm:$0xff]  }
  0xe9   :  { %v4737_v22 = vshrl.u32 %v240_v21, 7  ;;  %v4743_v24 = vld [vmem:[%s5073_s2] sm:$0xf]  ;;  %v3739_v46 = vld [vmem:[%s5074_s3 + $0x208] ss:$16 sps:$4 sm:$0xff]   ;;  %s3889_s27 = smov [#allocation2]  }
  0xea   :  { %v3736_v45 = vld [vmem:[%s5074_s3 + $0x200] ss:$16 sps:$4 sm:$0xff]   ;;  %v3744_v48 = vld [vmem:[%s5074_s3 + $0x224] ss:$16 sps:$4 sm:$0xff]   ;;  %s2893_s28 = sshll.u32 %s3889_s27, 4  ;;  %s2894_s28 = int_to_ptr.vmem [resolvable:$true] %s2893_s28 }
  0xeb   :  { %2385 = vmatpush1.bf16.msra.mxu0 %v3682_v49  ;;  %2467 = vmatpush1.bf16.msra.mxu1 %v3685_v50  ;;  %v242_v23 = vsub.s32 0, %v4737_v22  ;;  %v246_v25 = vsub.s32 1, %v4737_v22  ;;  %v254_v26 = vsub.s32 3, %v4737_v22  ;;  %v3747_v49 = vld [vmem:[%s5074_s3 + $0x22c] ss:$16 sps:$4 sm:$0xff]   ;;  %s3864_s29 = scalar_lea.vmem %s2894_s28, 128  ;;  %p3869_p1 = scmp.lt.s32.totalorder %s2894_s28, %s2894_s28 }
  0xec   :  { %2386 = vmatprep.subr.bf16.mxu0 %v3690_v51  ;;  %2468 = vmatprep.subr.bf16.mxu1 %v3693_v52  ;;  %v3742_v51 = vld [vmem:[%s5074_s3 + $0x220] ss:$16 sps:$4 sm:$0xff]   ;;  %v3745_v52 = vld [vmem:[%s5074_s3 + $0x228] ss:$16 sps:$4 sm:$0xff]   ;;  %v3798_v21 = vld [vmem:[%s5074_s3 + $0x344] ss:$16 sps:$4 sm:$0xff]   ;;  %p3865_p0 = scmp.ne.s32.totalorder %s2894_s28, %s3864_s29  ;;  %p3870_p2 = scmp.lt.s32.totalorder %s3864_s29, %s3864_s29 }
  0xed   :  { %v243_v27 = vrot.slane %v4743_v24, %v242_v23  ;;  %v247_v28 = vrot.slane %v4743_v24, %v246_v25  ;;  %v255_v29 = vrot.slane %v4743_v24, %v254_v26 }
  0xee   :  { %p3871_p3 = por %p3870_p2, %p3869_p1 }
  0xef   :  { %2387 = vmatpush1.bf16.msra.mxu0 %v3688_v53  ;;  %2469 = vmatpush1.bf16.msra.mxu1 %v3691_v54  ;;  %v3750_v53 = vld [vmem:[%s5074_s3 + $0x244] ss:$16 sps:$4 sm:$0xff]   ;;  %v3753_v54 = vld [vmem:[%s5074_s3 + $0x24c] ss:$16 sps:$4 sm:$0xff]  }
  0xf0   :  { %2388 = vmatprep.subr.bf16.mxu0 %v3696_v55  ;;  %2470 = vmatprep.subr.bf16.mxu1 %v3699_v56  ;;  %v3748_v55 = vld [vmem:[%s5074_s3 + $0x240] ss:$16 sps:$4 sm:$0xff]   ;;  %v3751_v56 = vld [vmem:[%s5074_s3 + $0x248] ss:$16 sps:$4 sm:$0xff]   ;;  %p3872_p4 = pnand %p3871_p3, %p3865_p0 }
  0xf3   :  { %2389 = vmatpush1.bf16.msra.mxu0 %v3694_v57  ;;  %2471 = vmatpush1.bf16.msra.mxu1 %v3697_v58  ;;  %v3756_v57 = vld [vmem:[%s5074_s3 + $0x264] ss:$16 sps:$4 sm:$0xff]   ;;  %v3759_v58 = vld [vmem:[%s5074_s3 + $0x26c] ss:$16 sps:$4 sm:$0xff]  }
  0xf4   :  { %2390 = vmatprep.subr.bf16.mxu0 %v3702_v59  ;;  %2472 = vmatprep.subr.bf16.mxu1 %v3705_v60  ;;  %v3754_v59 = vld [vmem:[%s5074_s3 + $0x260] ss:$16 sps:$4 sm:$0xff]   ;;  %v3757_v60 = vld [vmem:[%s5074_s3 + $0x268] ss:$16 sps:$4 sm:$0xff]  }
  0xf7   :  { %2391 = vmatpush1.bf16.msra.mxu0 %v3700_v61  ;;  %2473 = vmatpush1.bf16.msra.mxu1 %v3703_v62  ;;  %v3762_v61 = vld [vmem:[%s5074_s3 + $0x284] ss:$16 sps:$4 sm:$0xff]   ;;  %v3765_v62 = vld [vmem:[%s5074_s3 + $0x28c] ss:$16 sps:$4 sm:$0xff]  }
  0xf8   :  { %2392 = vmatprep.subr.bf16.mxu0 %v3708_v63  ;;  %2474 = vmatprep.subr.bf16.mxu1 %v3711_v0  ;;  %v3760_v63 = vld [vmem:[%s5074_s3 + $0x280] ss:$16 sps:$4 sm:$0xff]   ;;  %v3763_v0 = vld [vmem:[%s5074_s3 + $0x288] ss:$16 sps:$4 sm:$0xff]  }
  0xfb   :  { %2393 = vmatpush1.bf16.msra.mxu0 %v3706_v1  ;;  %2475 = vmatpush1.bf16.msra.mxu1 %v3709_v2  ;;  %v3768_v1 = vld [vmem:[%s5074_s3 + $0x2a4] ss:$16 sps:$4 sm:$0xff]   ;;  %v3771_v2 = vld [vmem:[%s5074_s3 + $0x2ac] ss:$16 sps:$4 sm:$0xff]  }
  0xfc   :  { %2394 = vmatprep.subr.bf16.mxu0 %v3714_v3  ;;  %2476 = vmatprep.subr.bf16.mxu1 %v3717_v4  ;;  %v3766_v3 = vld [vmem:[%s5074_s3 + $0x2a0] ss:$16 sps:$4 sm:$0xff]   ;;  %v3769_v4 = vld [vmem:[%s5074_s3 + $0x2a8] ss:$16 sps:$4 sm:$0xff]  }
  0xff   :  { %2395 = vmatpush1.bf16.msra.mxu0 %v3712_v5  ;;  %2477 = vmatpush1.bf16.msra.mxu1 %v3715_v6  ;;  %v3774_v5 = vld [vmem:[%s5074_s3 + $0x2c4] ss:$16 sps:$4 sm:$0xff]   ;;  %v3777_v6 = vld [vmem:[%s5074_s3 + $0x2cc] ss:$16 sps:$4 sm:$0xff]  }
 0x100   :  { %2396 = vmatprep.subr.bf16.mxu0 %v3720_v7  ;;  %2478 = vmatprep.subr.bf16.mxu1 %v3723_v8  ;;  %v3772_v7 = vld [vmem:[%s5074_s3 + $0x2c0] ss:$16 sps:$4 sm:$0xff]   ;;  %v3775_v8 = vld [vmem:[%s5074_s3 + $0x2c8] ss:$16 sps:$4 sm:$0xff]  }
 0x103   :  { %2397 = vmatpush1.bf16.msra.mxu0 %v3718_v9  ;;  %2479 = vmatpush1.bf16.msra.mxu1 %v3721_v10  ;;  %v3780_v9 = vld [vmem:[%s5074_s3 + $0x2e4] ss:$16 sps:$4 sm:$0xff]   ;;  %v3783_v10 = vld [vmem:[%s5074_s3 + $0x2ec] ss:$16 sps:$4 sm:$0xff]  }
 0x104   :  { %2398 = vmatprep.subr.bf16.mxu0 %v3726_v11  ;;  %2480 = vmatprep.subr.bf16.mxu1 %v3729_v12  ;;  %v3778_v11 = vld [vmem:[%s5074_s3 + $0x2e0] ss:$16 sps:$4 sm:$0xff]   ;;  %v3781_v12 = vld [vmem:[%s5074_s3 + $0x2e8] ss:$16 sps:$4 sm:$0xff]  }
 0x107   :  { %2399 = vmatpush1.bf16.msra.mxu0 %v3724_v13  ;;  %2481 = vmatpush1.bf16.msra.mxu1 %v3727_v14  ;;  %v3786_v13 = vld [vmem:[%s5074_s3 + $0x304] ss:$16 sps:$4 sm:$0xff]   ;;  %v3789_v14 = vld [vmem:[%s5074_s3 + $0x30c] ss:$16 sps:$4 sm:$0xff]  }
 0x108   :  { %2400 = vmatprep.subr.bf16.mxu0 %v3732_v15  ;;  %2482 = vmatprep.subr.bf16.mxu1 %v3735_v16  ;;  %v3784_v15 = vld [vmem:[%s5074_s3 + $0x300] ss:$16 sps:$4 sm:$0xff]   ;;  %v3787_v16 = vld [vmem:[%s5074_s3 + $0x308] ss:$16 sps:$4 sm:$0xff]  }
 0x10b   :  { %2401 = vmatpush1.bf16.msra.mxu0 %v3730_v17  ;;  %2483 = vmatpush1.bf16.msra.mxu1 %v3733_v18  ;;  %v3792_v17 = vld [vmem:[%s5074_s3 + $0x324] ss:$16 sps:$4 sm:$0xff]   ;;  %v3795_v18 = vld [vmem:[%s5074_s3 + $0x32c] ss:$16 sps:$4 sm:$0xff]  }
 0x10c   :  { %2411 = vmatprep.subr.bf16.mxu0 %v3738_v19  ;;  %2493 = vmatprep.subr.bf16.mxu1 %v3741_v20  ;;  %v3790_v19 = vld [vmem:[%s5074_s3 + $0x320] ss:$16 sps:$4 sm:$0xff]   ;;  %v3793_v20 = vld [vmem:[%s5074_s3 + $0x328] ss:$16 sps:$4 sm:$0xff]  }
 0x1a1   :  { %v1401_v30 = vpop.f32.mrb[0].mxu0  ;;  %v4756_v31 = vpop.f32.mrb[0].mxu1 }
 0x1a2   :  { %v3304_v32 = vadd.f32 %v1401_v30, %v243_v27  ;;  %v1403_v33 = vpop.f32.mrb[1].mxu0  ;;  %v1567_v34 = vpop.f32.mrb[1].mxu1  ;;  %v3801_v27 = vld [vmem:[%s5074_s3 + $0x34c] ss:$16 sps:$4 sm:$0xff]   ;;  %v3804_v30 = vld [vmem:[%s5074_s3 + $0x364] ss:$16 sps:$4 sm:$0xff]  }
 0x1a3   :  { %v3305_v35 = vadd.f32 %v1403_v33, %v247_v28  ;;  %v3307_v36 = vadd.f32 %v1567_v34, %v255_v29  ;;  %v1405_v37 = vpop.f32.mrb[2].mxu0  ;;  %v1569_v38 = vpop.f32.mrb[2].mxu1  ;;  %v3796_v28 = vld [vmem:[%s5074_s3 + $0x340] ss:$16 sps:$4 sm:$0xff]   ;;  %v3799_v29 = vld [vmem:[%s5074_s3 + $0x348] ss:$16 sps:$4 sm:$0xff]  }
 0x1a4   :  { %v1572_v39 = vmax.f32 %v3304_v32, 0.0  ;;  %v1406_v40 = vpop.f32.mrb[3].mxu0  ;;  %v1570_v41 = vpop.f32.mrb[3].mxu1  ;;  %v3807_v32 = vld [vmem:[%s5074_s3 + $0x36c] ss:$16 sps:$4 sm:$0xff]  }
 0x1a5   :  { %v1573_v42 = vmax.f32 %v3305_v35, 0.0  ;;  %v1575_v43 = vmax.f32 %v3307_v36, 0.0  ;;  %v3802_v33 = vld [vmem:[%s5074_s3 + $0x360] ss:$16 sps:$4 sm:$0xff]   ;;  %v3805_v34 = vld [vmem:[%s5074_s3 + $0x368] ss:$16 sps:$4 sm:$0xff]  }
 0x1a6   :  { %v1576_v47 = vpack.c.bf16 %v1572_v39, %v1572_v39  ;;  %v3810_v35 = vld [vmem:[%s5074_s3 + $0x384] ss:$16 sps:$4 sm:$0xff]   ;;  %v3813_v36 = vld [vmem:[%s5074_s3 + $0x38c] ss:$16 sps:$4 sm:$0xff]   ;;  %v3808_v37 = vld [vmem:[%s5074_s3 + $0x380] ss:$16 sps:$4 sm:$0xff]  }
 0x1a7   :  { %v1577_v44 = vpack.c.bf16 %v1573_v42, %v1573_v42  ;;  %v1579_v50 = vpack.c.bf16 %v1575_v43, %v1575_v43  ;;  %v3811_v38 = vld [vmem:[%s5074_s3 + $0x388] ss:$16 sps:$4 sm:$0xff]   ;;  %v250_v39 = vsub.s32 2, %v4737_v22  ;;  %v3816_v40 = vld [vmem:[%s5074_s3 + $0x3a4] ss:$16 sps:$4 sm:$0xff]  }
 0x1a8   :  { %v3819_v41 = vld [vmem:[%s5074_s3 + $0x3ac] ss:$16 sps:$4 sm:$0xff]   ;;  %v3814_v42 = vld [vmem:[%s5074_s3 + $0x3a0] ss:$16 sps:$4 sm:$0xff]   ;;  %v3817_v43 = vld [vmem:[%s5074_s3 + $0x3a8] ss:$16 sps:$4 sm:$0xff]  }
 0x1a9   :  { %2402 = vmatprep.mubr.bf16.mxu0 %v1577_v44  ;;  %2484 = vmatprep.mubr.bf16.mxu1 %v1577_v44  ;;  %v251_v44 = vrot.slane %v4743_v24, %v250_v39  ;;  %v3823_v24 = vld [vmem:[%s5074_s3 + $0x3c8] ss:$16 sps:$4 sm:$0xff]  }
 0x1aa   :  { %2403 = vmatmul.mubr.bf16.vlgmr.msra.gmra.mrb[4].mxu0 %v1576_v47  ;;  %2485 = vmatmul.mubr.bf16.vlgmr.msra.gmra.mrb[4].mxu1 %v1576_v47  ;;  %v3820_v47 = vld [vmem:[%s5074_s3 + $0x3c0] ss:$16 sps:$4 sm:$0xff]  }
 0x1ab   :  { %2412 = vmatpush1.bf16.msra.mxu0 %v3736_v45  ;;  %2494 = vmatpush1.bf16.msra.mxu1 %v3739_v46  ;;  %v3822_v45 = vld [vmem:[%s5074_s3 + $0x3c4] ss:$16 sps:$4 sm:$0xff]   ;;  %v3825_v46 = vld [vmem:[%s5074_s3 + $0x3cc] ss:$16 sps:$4 sm:$0xff]  }
 0x1ac   :  { %2443 = vmatprep.mubr.bf16.mxu0 %v1579_v50  ;;  %2525 = vmatprep.mubr.bf16.mxu1 %v1579_v50  ;;  %v3831_v50 = vld [vmem:[%s5074_s3 + $0x3ec] ss:$16 sps:$4 sm:$0xff]  }
 0x1ad   :  { %2413 = vmatprep.subr.bf16.mxu0 %v3744_v48  ;;  %2495 = vmatprep.subr.bf16.mxu1 %v3747_v49  ;;  %v3306_v48 = vadd.f32 %v4756_v31, %v251_v44  ;;  %v3828_v49 = vld [vmem:[%s5074_s3 + $0x3e4] ss:$16 sps:$4 sm:$0xff]   ;;  %v3829_v31 = vld [vmem:[%s5074_s3 + $0x3e8] ss:$16 sps:$4 sm:$0xff]  }
 0x1af   :  { %2414 = vmatpush1.bf16.msra.mxu0 %v3742_v51  ;;  %2496 = vmatpush1.bf16.msra.mxu1 %v3745_v52  ;;  %v3826_v51 = vld [vmem:[%s5074_s3 + $0x3e0] ss:$16 sps:$4 sm:$0xff]   ;;  %v1574_v52 = vmax.f32 %v3306_v48, 0.0 }
 0x1b0   :  { %2415 = vmatprep.subr.bf16.mxu0 %v3750_v53  ;;  %2497 = vmatprep.subr.bf16.mxu1 %v3753_v54  ;;  %v3832_v53 = vld [vmem:[%s5076_s5 + $0x40] sm:$0xff]  }
 0x1b1   :  { %v3833_v54 = vld [vmem:[%s5076_s5 + $0xc0] sm:$0xff]  }
 0x1b3   :  { %2416 = vmatpush1.bf16.msra.mxu0 %v3748_v55  ;;  %2498 = vmatpush1.bf16.msra.mxu1 %v3751_v56  ;;  %v3834_v55 = vld [vmem:[%s5076_s5] sm:$0xff]  }
 0x1b4   :  { %2417 = vmatprep.subr.bf16.mxu0 %v3756_v57  ;;  %2499 = vmatprep.subr.bf16.mxu1 %v3759_v58  ;;  %v3835_v56 = vld [vmem:[%s5076_s5 + $0x80] sm:$0xff]   ;;  %v1578_v57 = vpack.c.bf16 %v1574_v52, %v1574_v52  ;;  %v3836_v58 = vld [vmem:[%s5076_s5 + $0x48] sm:$0xff]  }
 0x1b7   :  { %2418 = vmatpush1.bf16.msra.mxu0 %v3754_v59  ;;  %2500 = vmatpush1.bf16.msra.mxu1 %v3757_v60  ;;  %v3837_v59 = vld [vmem:[%s5076_s5 + $0xc8] sm:$0xff]  }
 0x1b8   :  { %2419 = vmatprep.subr.bf16.mxu0 %v3762_v61  ;;  %2501 = vmatprep.subr.bf16.mxu1 %v3765_v62  ;;  %v3838_v60 = vld [vmem:[%s5076_s5 + $0x8] sm:$0xff]   ;;  %v3840_v62 = vld [vmem:[%s5076_s5 + $0x50] sm:$0xff]  }
 0x1b9   :  { %v3839_v61 = vld [vmem:[%s5076_s5 + $0x88] sm:$0xff]  }
 0x1bb   :  { %2420 = vmatpush1.bf16.msra.mxu0 %v3760_v63  ;;  %2502 = vmatpush1.bf16.msra.mxu1 %v3763_v0  ;;  %v3841_v63 = vld [vmem:[%s5076_s5 + $0xd0] sm:$0xff]  }
 0x1bc   :  { %2421 = vmatprep.subr.bf16.mxu0 %v3768_v1  ;;  %2503 = vmatprep.subr.bf16.mxu1 %v3771_v2  ;;  %v3842_v0 = vld [vmem:[%s5076_s5 + $0x10] sm:$0xff]   ;;  %v3844_v2 = vld [vmem:[%s5076_s5 + $0x58] sm:$0xff]  }
 0x1bd   :  { %v3843_v1 = vld [vmem:[%s5076_s5 + $0x90] sm:$0xff]  }
 0x1bf   :  { %2422 = vmatpush1.bf16.msra.mxu0 %v3766_v3  ;;  %2504 = vmatpush1.bf16.msra.mxu1 %v3769_v4  ;;  %v3845_v3 = vld [vmem:[%s5076_s5 + $0xd8] sm:$0xff]  }
 0x1c0   :  { %2423 = vmatprep.subr.bf16.mxu0 %v3774_v5  ;;  %2505 = vmatprep.subr.bf16.mxu1 %v3777_v6  ;;  %v3846_v4 = vld [vmem:[%s5076_s5 + $0x18] sm:$0xff]   ;;  %v3848_v6 = vld [vmem:[%s5076_s5 + $0x60] sm:$0xff]  }
 0x1c1   :  { %v3847_v5 = vld [vmem:[%s5076_s5 + $0x98] sm:$0xff]  }
 0x1c3   :  { %2424 = vmatpush1.bf16.msra.mxu0 %v3772_v7  ;;  %2506 = vmatpush1.bf16.msra.mxu1 %v3775_v8  ;;  %v3849_v7 = vld [vmem:[%s5076_s5 + $0xe0] sm:$0xff]  }
 0x1c4   :  { %2425 = vmatprep.subr.bf16.mxu0 %v3780_v9  ;;  %2507 = vmatprep.subr.bf16.mxu1 %v3783_v10  ;;  %v3850_v8 = vld [vmem:[%s5076_s5 + $0x20] sm:$0xff]   ;;  %v3852_v10 = vld [vmem:[%s5076_s5 + $0x68] sm:$0xff]  }
 0x1c5   :  { %v3851_v9 = vld [vmem:[%s5076_s5 + $0xa0] sm:$0xff]  }
 0x1c7   :  { %2426 = vmatpush1.bf16.msra.mxu0 %v3778_v11  ;;  %2508 = vmatpush1.bf16.msra.mxu1 %v3781_v12  ;;  %v3853_v11 = vld [vmem:[%s5076_s5 + $0xe8] sm:$0xff]  }
 0x1c8   :  { %2427 = vmatprep.subr.bf16.mxu0 %v3786_v13  ;;  %2509 = vmatprep.subr.bf16.mxu1 %v3789_v14  ;;  %v3854_v12 = vld [vmem:[%s5076_s5 + $0x28] sm:$0xff]   ;;  %v3856_v14 = vld [vmem:[%s5076_s5 + $0x70] sm:$0xff]  }
 0x1c9   :  { %v3855_v13 = vld [vmem:[%s5076_s5 + $0xa8] sm:$0xff]  }
 0x1cb   :  { %2428 = vmatpush1.bf16.msra.mxu0 %v3784_v15  ;;  %2510 = vmatpush1.bf16.msra.mxu1 %v3787_v16  ;;  %v3857_v15 = vld [vmem:[%s5076_s5 + $0xf0] sm:$0xff]  }
 0x1cc   :  { %2429 = vmatprep.subr.bf16.mxu0 %v3792_v17  ;;  %2511 = vmatprep.subr.bf16.mxu1 %v3795_v18  ;;  %v3858_v16 = vld [vmem:[%s5076_s5 + $0x30] sm:$0xff]   ;;  %v3860_v18 = vld [vmem:[%s5076_s5 + $0x78] sm:$0xff]  }
 0x1cd   :  { %v3859_v17 = vld [vmem:[%s5076_s5 + $0xb0] sm:$0xff]  }
 0x1cf   :  { %2430 = vmatpush1.bf16.msra.mxu0 %v3790_v19  ;;  %2512 = vmatpush1.bf16.msra.mxu1 %v3793_v20  ;;  %v3861_v19 = vld [vmem:[%s5076_s5 + $0xf8] sm:$0xff]  }
 0x1d0   :  { %2431 = vmatprep.subr.bf16.mxu0 %v3798_v21  ;;  %2513 = vmatprep.subr.bf16.mxu1 %v3801_v27  ;;  %v3862_v20 = vld [vmem:[%s5076_s5 + $0x38] sm:$0xff]   ;;  %v1708_v27 = vld [vmem:[%s5075_s4] sm:$0xf] }
 0x1d1   :  { %v3863_v21 = vld [vmem:[%s5076_s5 + $0xb8] sm:$0xff]  }
 0x1d3   :  { %2432 = vmatpush1.bf16.msra.mxu0 %v3796_v28  ;;  %2514 = vmatpush1.bf16.msra.mxu1 %v3799_v29  ;;  %v1713_v28 = vrot.slane %v1708_v27, %v242_v23  ;;  %v1721_v29 = vrot.slane %v1708_v27, %v250_v39 }
 0x1d4   :  { %2433 = vmatprep.subr.bf16.mxu0 %v3804_v30  ;;  %2515 = vmatprep.subr.bf16.mxu1 %v3807_v32  ;;  %v1717_v30 = vrot.slane %v1708_v27, %v246_v25  ;;  %v1725_v32 = vrot.slane %v1708_v27, %v254_v26 }
 0x1d7   :  { %2434 = vmatpush1.bf16.msra.mxu0 %v3802_v33  ;;  %2516 = vmatpush1.bf16.msra.mxu1 %v3805_v34 }
 0x1d8   :  { %2435 = vmatprep.subr.bf16.mxu0 %v3810_v35  ;;  %2517 = vmatprep.subr.bf16.mxu1 %v3813_v36 }
 0x1db   :  { %2436 = vmatpush1.bf16.msra.mxu0 %v3808_v37  ;;  %2518 = vmatpush1.bf16.msra.mxu1 %v3811_v38 }
 0x1dc   :  { %2437 = vmatprep.subr.bf16.mxu0 %v3816_v40  ;;  %2519 = vmatprep.subr.bf16.mxu1 %v3819_v41 }
 0x1df   :  { %2438 = vmatpush1.bf16.msra.mxu0 %v3814_v42  ;;  %2520 = vmatpush1.bf16.msra.mxu1 %v3817_v43 }
 0x1e0   :  { %2439 = vmatprep.subr.bf16.mxu0 %v3822_v45  ;;  %2521 = vmatprep.subr.bf16.mxu1 %v3825_v46 }
 0x1e3   :  { %2440 = vmatpush1.bf16.msra.mxu0 %v3820_v47  ;;  %2522 = vmatpush1.bf16.msra.mxu1 %v3823_v24 }
 0x1e4   :  { %2441 = vmatprep.subr.bf16.mxu0 %v3828_v49  ;;  %2523 = vmatprep.subr.bf16.mxu1 %v3831_v50  ;;  %v3227_v50 = vld [vmem:[%s5077_s6] ss:$0 sm:$0xff] }
 0x1e7   :  { %2442 = vmatpush1.bf16.msra.mxu0 %v3826_v51  ;;  %2524 = vmatpush1.bf16.msra.mxu1 %v3829_v31 }
 0x1e8   :  { %3260 = vmatprep.subr.bf16.mxu0 %v3832_v53  ;;  %3282 = vmatprep.subr.bf16.mxu1 %v3833_v54 }
 0x1ea   :  { %2444 = vmatmul.mubr.bf16.vlgmr.msra.gmra.mrb[4].mxu0 %v1578_v57  ;;  %2526 = vmatmul.mubr.bf16.vlgmr.msra.gmra.mrb[4].mxu1 %v1578_v57 }
 0x1eb   :  { %3261 = vmatpush3.bf16.msra.mxu0 %v3834_v55  ;;  %3283 = vmatpush3.bf16.msra.mxu1 %v3835_v56 }
 0x1ec   :  { %3262 = vmatprep.subr.bf16.mxu0 %v3836_v58  ;;  %3284 = vmatprep.subr.bf16.mxu1 %v3837_v59 }
 0x1ef   :  { %3263 = vmatpush3.bf16.msra.mxu0 %v3838_v60  ;;  %3285 = vmatpush3.bf16.msra.mxu1 %v3839_v61 }
 0x1f0   :  { %3264 = vmatprep.subr.bf16.mxu0 %v3840_v62  ;;  %3286 = vmatprep.subr.bf16.mxu1 %v3841_v63 }
 0x1f3   :  { %3265 = vmatpush3.bf16.msra.mxu0 %v3842_v0  ;;  %3287 = vmatpush3.bf16.msra.mxu1 %v3843_v1 }
 0x1f4   :  { %3266 = vmatprep.subr.bf16.mxu0 %v3844_v2  ;;  %3288 = vmatprep.subr.bf16.mxu1 %v3845_v3 }
 0x1f7   :  { %3267 = vmatpush3.bf16.msra.mxu0 %v3846_v4  ;;  %3289 = vmatpush3.bf16.msra.mxu1 %v3847_v5 }
 0x1f8   :  { %3268 = vmatprep.subr.bf16.mxu0 %v3848_v6  ;;  %3290 = vmatprep.subr.bf16.mxu1 %v3849_v7 }
 0x1fb   :  { %3269 = vmatpush3.bf16.msra.mxu0 %v3850_v8  ;;  %3291 = vmatpush3.bf16.msra.mxu1 %v3851_v9 }
 0x1fc   :  { %3270 = vmatprep.subr.bf16.mxu0 %v3852_v10  ;;  %3292 = vmatprep.subr.bf16.mxu1 %v3853_v11 }
 0x1ff   :  { %3271 = vmatpush3.bf16.msra.mxu0 %v3854_v12  ;;  %3293 = vmatpush3.bf16.msra.mxu1 %v3855_v13 }
 0x200   :  { %3272 = vmatprep.subr.bf16.mxu0 %v3856_v14  ;;  %3294 = vmatprep.subr.bf16.mxu1 %v3857_v15 }
 0x203   :  { %3273 = vmatpush3.bf16.msra.mxu0 %v3858_v16  ;;  %3295 = vmatpush3.bf16.msra.mxu1 %v3859_v17 }
 0x204   :  { %3274 = vmatprep.subr.bf16.mxu0 %v3860_v18  ;;  %3296 = vmatprep.subr.bf16.mxu1 %v3861_v19 }
 0x207   :  { %3275 = vmatpush3.bf16.msra.mxu0 %v3862_v20  ;;  %3297 = vmatpush3.bf16.msra.mxu1 %v3863_v21 }
 0x2bd   :  { %v2445_v33 = vpop.f32.mrb[4].mxu0  ;;  %v2527_v34 = vpop.f32.mrb[4].mxu1 }
 0x2be   :  { %v3308_v35 = vadd.f32 %v2445_v33, %v1713_v28  ;;  %v3310_v36 = vadd.f32 %v2527_v34, %v1721_v29  ;;  %v2447_v37 = vpop.f32.mrb[5].mxu0  ;;  %v2529_v38 = vpop.f32.mrb[5].mxu1 }
 0x2bf   :  { %v3309_v40 = vadd.f32 %v2447_v37, %v1717_v30  ;;  %v3311_v41 = vadd.f32 %v2529_v38, %v1725_v32  ;;  %v2449_v42 = vpop.f32.mrb[6].mxu0  ;;  %v2531_v43 = vpop.f32.mrb[6].mxu1 }
 0x2c0   :  { %v2534_v23 = vmax.f32 %v3308_v35, 0.0  ;;  %v2536_v44 = vmax.f32 %v3310_v36, 0.0  ;;  %v2450_v45 = vpop.f32.mrb[7].mxu0  ;;  %v2532_v39 = vpop.f32.mrb[7].mxu1 }
 0x2c1   :  { %v2535_v46 = vmax.f32 %v3309_v40, 0.0  ;;  %v2537_v47 = vmax.f32 %v3311_v41, 0.0 }
 0x2c2   :  { %v2538_v22 = vpack.c.bf16 %v2534_v23, %v2534_v23  ;;  %v2540_v26 = vpack.c.bf16 %v2536_v44, %v2536_v44 }
 0x2c3   :  { %v2539_v25 = vpack.c.bf16 %v2535_v46, %v2535_v46  ;;  %v2541_v24 = vpack.c.bf16 %v2537_v47, %v2537_v47 }
 0x2c5   :  { %2837 = vmatprep.mubr.bf16.mxu0 %v2539_v25  ;;  %2877 = vmatprep.mubr.bf16.mxu1 %v2541_v24 }
 0x2c6   :  { %2838 = vmatmul.mubr.bf16.vlgmr.msra.gmra.mrb[8].mxu0 %v2538_v22  ;;  %2878 = vmatmul.mubr.bf16.vlgmr.msra.gmra.mrb[8].mxu1 %v2540_v26 }
 0x399   :  { %v3276_v48 = vpop.f32.mrb[8].mxu0  ;;  %v3298_v49 = vpop.f32.mrb[8].mxu1 }
 0x39a   :  { %v3277_v51 = vpop.f32.mrb[9].mxu0  ;;  %v3299_v31 = vpop.f32.mrb[9].mxu1 }
 0x39b   :  { %v3278_v52 = vadd.f32 %v3277_v51, %v3276_v48  ;;  %v3300_v53 = vadd.f32 %v3299_v31, %v3298_v49  ;;  %v3279_v54 = vpop.f32.mrb[10].mxu0  ;;  %v3301_v55 = vpop.f32.mrb[10].mxu1 }
 0x39c   :  { %v3280_v56 = vpop.f32.mrb[11].mxu0  ;;  %v3302_v57 = vpop.f32.mrb[11].mxu1 }
 0x39d   :  { %v2840_v58 = vadd.f32 %v3278_v52, %v3227_v50 }
 0x39f   :  { %v2880_v59 = vadd.f32 %v3300_v53, %v2840_v58 }
 0x3a1   :  { %v2885_v60 = vmax.f32 %v2880_v59, 0.0 }
 0x3a3   :  { %2886 = vst [vmem:[#allocation2] sm:$0xff] %v2885_v60 }
 0x3a4   :  { %3875 = shalt.err (!%p3872_p4)
}
 0x3a5   :  { %s3876_s8 = scalar_lea.hbm %s5078_s7, 128 }
 0x3a6   :  { %p3877_p5 = scmp.ne.s32.totalorder %s5078_s7, %s3876_s8  ;;  %p3880_p6 = scmp.lt.u32.totalorder %s3876_s8, %s5078_s7 }
 0x3a8   :  { %p3882_p7 = pnand %p3880_p6, %p3877_p5 }
 0x3aa   :  { %3885 = shalt.err (!%p3882_p7)
}
 0x3ab   :  { %2896 = dma.vmem_to_hbm [thread:$0]  %s2894_s28, 128, %s5078_s7, [#allocation3]  }
 0x3ac   :  { %3886 = dma.done.wait [#allocation3], 128  }
 0x3ad   :  { %3887 = vsyncadd [#allocation3], 4294967168 }
 0x3ae   :  { %2900 = vsyncpa [#allocation3], 1 }

</bundles_post_ra>
